<compile_context>
chip_gen: v7x
topology: tpu7x:2x2x1
jax: 0.10.0
libtpu: 0.0.40
codegen_flags: <defaults>
</compile_context>

<pallas_src>
import math
from functools import partial

import jax
import jax.numpy as jnp
from jax import lax
from jax.experimental import pallas as pl
from jax.experimental.pallas import tpu as pltpu

jax.config.update("jax_default_matmul_precision", "highest")

_MPSILU_INV = 1.0 / 0.596


def _round_up(x, m):
    return (x + m - 1) // m * m


# ----------------------------------------------------------------------------
# Fused Decoder kernel (one batch element per grid step)
# ----------------------------------------------------------------------------
def _decoder_kernel(x_ref, w1_ref, w2_ref, wres_ref, scale_ref, o_ref,
                    xact_ref, hpad_ref, *, H, W, PADF, K, ca, cb):
    HW = H * W
    CIN = x_ref.shape[1]       # sublane-padded input channels
    COUT = o_ref.shape[1]      # sublane-padded output channels

    def mpsilu(v):             # F.silu(v) / 0.596
        return v * (1.0 / (1.0 + jnp.exp(-v))) * _MPSILU_INV

    # Pre-activation applied ONCE to the whole zero-haloed tile (mpsilu(0)=0,
    # so the halo / channel padding stays zero).
    x = x_ref[0].astype(jnp.float32)                       # (CIN, Lp)
    xact_ref[...] = mpsilu(x)

    def gather_taps(src_ref, C):
        """im2col: stack the K*K shifted views into ONE (K*K*C, HW) matrix.

        src_ref is flattened as h*W + w and zero-padded by PADF lanes on both
        sides, so a spatial shift (dh, dw) is a *contiguous* lane slice at
        offset PADF + dh*W + dw — no strided slice / reshape relayouts.
        Only w-wraparound needs a mask; h-overflow lands in the zero halo.
        """
        ww = lax.broadcasted_iota(jnp.int32, (C, HW), 1) % W
        pieces = []
        for kh in range(K):
            for kw in range(K):
                dh, dw = kh - K // 2, kw - K // 2
                s = PADF + dh * W + dw
                piece = src_ref[:, s:s + HW].astype(jnp.float32)
                if dw < 0:
                    piece = jnp.where(ww >= -dw, piece, 0.0)
                elif dw > 0:
                    piece = jnp.where(ww < W - dw, piece, 0.0)
                pieces.append(piece)
        return jnp.concatenate(pieces, axis=0)             # (K*K*C, HW)

    # --- residual branch: 1x1 conv == plain channel matmul (lane-dense out) --
    x_center = x[:, PADF:PADF + HW]                        # (CIN, HW)
    res = jnp.dot(wres_ref[...].astype(jnp.float32), x_center,
                  preferred_element_type=jnp.float32)      # (COUT, HW)

    # --- block1: conv3x3(MPSiLU(x)) as a single MXU contraction --------------
    p1 = gather_taps(xact_ref, CIN)                        # (9*CIN, HW)
    h = jnp.dot(w1_ref[...].astype(jnp.float32), p1,
                preferred_element_type=jnp.float32)        # (COUT, HW)

    # --- embedding scale (per batch & channel), fused into the epilogue ------
    h = h * scale_ref[0]                                   # (COUT,1) broadcast
    h = mpsilu(h)

    # --- re-halo h in VMEM, then block2: conv3x3 as one contraction ----------
    hpad_ref[...] = jnp.zeros_like(hpad_ref)
    hpad_ref[:, PADF:PADF + HW] = h
    p2 = gather_taps(hpad_ref, COUT)                       # (9*COUT, HW)
    h2 = jnp.dot(w2_ref[...].astype(jnp.float32), p2,
                 preferred_element_type=jnp.float32)       # (COUT, HW)

    # --- magnitude-preserving residual add (MPAdd) ----------------------------
    o_ref[0] = (ca * h2 + cb * res).astype(o_ref.dtype)


# ----------------------------------------------------------------------------
# Wrapper: parameter prep (tiny, plain jnp) + the fused pallas_call
# ----------------------------------------------------------------------------
def _normalize_weight(w, fan_in, eps):
    """normalize_weight(w, eps) / sqrt(fan_in), using rsqrt (EUP) not sqrt+div."""
    O = w.shape[0]
    w2 = w.reshape(O, -1).astype(jnp.float32)
    ss = jnp.sum(w2 * w2, axis=-1, keepdims=True)
    # 1/max(||w||, eps) == rsqrt(max(||w||^2, eps^2))
    scl = math.sqrt(w2.shape[1]) / math.sqrt(fan_in)       # sqrt(numel/O)/sqrt(fan_in)
    return (w2 * (lax.rsqrt(jnp.maximum(ss, eps * eps)) * scl)).reshape(w.shape)


def _conv3x3_weight_matrix(w, cin_p, cout_p):
    """(O, I, 3, 3) -> (cout_p, 9*cin_p); columns ordered tap-major, channel-minor."""
    O, I, KH, KW = w.shape
    wt = jnp.transpose(w, (0, 2, 3, 1)).reshape(O, KH * KW, I)
    wt = jnp.pad(wt, ((0, cout_p - O), (0, 0), (0, cin_p - I)))
    return wt.reshape(cout_p, KH * KW * cin_p)


def decoder_forward(x, emb, params, *, dim, dim_out, emb_dim=None,
                    mp_add_t=0.3, eps=1e-4):
    """Eval-mode forward of karras_unet.Decoder (has_attn=False, upsample=False)."""
    N, C, H, W = x.shape
    assert C == dim
    HW = H * W
    PADF = W + 1                              # halo for 3x3 'same' in flat layout
    LP = HW + 2 * PADF
    CIN_P = _round_up(dim, 8)
    COUT_P = _round_up(dim_out, 8)

    # ---- weight prep (tiny arrays, no extra kernel launch) ------------------
    w1m = _conv3x3_weight_matrix(
        _normalize_weight(params['w1'], dim * 9, eps), CIN_P, COUT_P)
    w2m = _conv3x3_weight_matrix(
        _normalize_weight(params['w2'], dim_out * 9, eps), COUT_P, COUT_P)
    if dim != dim_out:
        wr = _normalize_weight(params['w_res'], dim, eps).reshape(dim_out, dim)
        wrm = jnp.pad(wr, ((0, COUT_P - dim_out), (0, CIN_P - dim)))
    else:
        wrm = jnp.eye(COUT_P, CIN_P, dtype=jnp.float32)    # nn.Identity residual

    # ---- per-(batch, channel) scale from the embedding (Linear_wn + Gain + 1)
    if emb is not None:
        wl = _normalize_weight(params['w_emb'], emb_dim, eps)
        scale = params['gain'] * jnp.dot(emb.astype(jnp.float32), wl.T,
                                         precision=lax.Precision.HIGHEST) + 1.0
    else:
        scale = jnp.ones((N, dim_out), jnp.float32)
    scale = jnp.pad(scale, ((0, 0), (0, COUT_P - dim_out)))[..., None]  # (N,COUT_P,1)

    # ---- input: keep NCHW, flatten spatial onto the lane axis, pad channels
    #      to a sublane multiple and add the +-(W+1)-lane zero halo.
    xf = jnp.pad(x.reshape(N, dim, HW),
                 ((0, 0), (0, CIN_P - dim), (PADF, PADF)))

    t = mp_add_t
    den = math.sqrt((1.0 - t) ** 2 + t ** 2)
    ca, cb = (1.0 - t) / den, t / den

    out = pl.pallas_call(
        partial(_decoder_kernel, H=H, W=W, PADF=PADF, K=3, ca=ca, cb=cb),
        out_shape=jax.ShapeDtypeStruct((N, COUT_P, HW), x.dtype),
        grid=(N,),
        in_specs=[
            pl.BlockSpec((1, CIN_P, LP), lambda n: (n, 0, 0)),        # x tile
            pl.BlockSpec((COUT_P, 9 * CIN_P), lambda n: (0, 0)),      # w1 (resident)
            pl.BlockSpec((COUT_P, 9 * COUT_P), lambda n: (0, 0)),     # w2 (resident)
            pl.BlockSpec((COUT_P, CIN_P), lambda n: (0, 0)),          # w_res (resident)
            pl.BlockSpec((1, COUT_P, 1), lambda n: (n, 0, 0)),        # emb scale
        ],
        out_specs=pl.BlockSpec((1, COUT_P, HW), lambda n: (n, 0, 0)),
        scratch_shapes=[
            pltpu.VMEM((CIN_P, LP), jnp.float32),    # activated / haloed input
            pltpu.VMEM((COUT_P, LP), jnp.float32),   # haloed block1 output
        ],
        compiler_params=pltpu.CompilerParams(
            dimension_semantics=("parallel",)),
        # NOTE: for production feature maps, add H-row / Cout tiling to this
        # grid (required to fit v7x's 64 MiB VMEM and to feed both TensorCores)
        # and feed the MXU bf16 operands with f32 accumulation.
    )(xf, w1m, w2m, wrm, scale)

    return out[:, :dim_out, :].reshape(N, dim_out, H, W)


# ----------------------------------------------------------------------------
# Pure-JAX reference for validation
# ----------------------------------------------------------------------------
def _normalize_weight_ref(w, eps):
    O = w.shape[0]
    w2 = w.reshape(O, -1)
    n = jnp.sqrt(jnp.sum(w2 * w2, axis=-1, keepdims=True))
    w2 = w2 / jnp.maximum(n, eps) * math.sqrt(w2.shape[1])
    return w2.reshape(w.shape)


def _conv_same_ref(x, w):
    return lax.conv_general_dilated(
        x, w, window_strides=(1, 1), padding='SAME',
        dimension_numbers=('NCHW', 'OIHW', 'NCHW'),
        precision=lax.Precision.HIGHEST)


def decoder_reference(x, emb, params, *, dim, dim_out, emb_dim=None,
                      mp_add_t=0.3, eps=1e-4):
    def mpsilu(v):
        return jax.nn.silu(v) / 0.596

    if dim != dim_out:
        wr = _normalize_weight_ref(params['w_res'], eps) / math.sqrt(dim)
        res = _conv_same_ref(x, wr)
    else:
        res = x
    w1 = _normalize_weight_ref(params['w1'], eps) / math.sqrt(dim * 9)
    w2 = _normalize_weight_ref(params['w2'], eps) / math.sqrt(dim_out * 9)
    h = _conv_same_ref(mpsilu(x), w1)
    if emb is not None:
        wl = _normalize_weight_ref(params['w_emb'], eps) / math.sqrt(emb_dim)
        scale = params['gain'] * (emb @ wl.T) + 1.0
        h = h * scale[:, :, None, None]
    h = _conv_same_ref(mpsilu(h), w2)
    t = mp_add_t
    return (h * (1.0 - t) + res * t) / math.sqrt((1.0 - t) ** 2 + t ** 2)


if __name__ == "__main__":
    key = jax.random.PRNGKey(0)
    k = jax.random.split(key, 8)

    # Case 1: dim != dim_out (1x1 res conv), with embedding conditioning.
    N, dim, dim_out, H, W, emb_dim = 2, 4, 8, 16, 16, 32
    x = jax.random.normal(k[0], (N, dim, H, W), dtype=jnp.float32)
    emb = jax.random.normal(k[1], (N, emb_dim), dtype=jnp.float32)
    params = dict(
        w1=jax.random.normal(k[2], (dim_out, dim, 3, 3), dtype=jnp.float32),
        w2=jax.random.normal(k[3], (dim_out, dim_out, 3, 3), dtype=jnp.float32),
        w_res=jax.random.normal(k[4], (dim_out, dim, 1, 1), dtype=jnp.float32),
        w_emb=jax.random.normal(k[5], (dim_out, emb_dim), dtype=jnp.float32),
        gain=jnp.float32(0.25),
    )
    out1 = decoder_forward(x, emb, params, dim=dim, dim_out=dim_out, emb_dim=emb_dim)
    out1 = jax.block_until_ready(out1)
    ref1 = decoder_reference(x, emb, params, dim=dim, dim_out=dim_out, emb_dim=emb_dim)
    assert out1.shape == (N, dim_out, H, W)
    assert jnp.allclose(out1, ref1, atol=2e-2, rtol=2e-2), \
        float(jnp.max(jnp.abs(out1 - ref1)))

    # Case 2: dim == dim_out (Identity residual), no embedding.
    dim2 = dim_out2 = 8
    x2 = jax.random.normal(k[6], (N, dim2, H, W), dtype=jnp.float32)
    params2 = dict(
        w1=jax.random.normal(k[7], (dim_out2, dim2, 3, 3), dtype=jnp.float32),
        w2=jax.random.normal(k[0], (dim_out2, dim_out2, 3, 3), dtype=jnp.float32),
    )
    out2 = decoder_forward(x2, None, params2, dim=dim2, dim_out=dim_out2)
    out2 = jax.block_until_ready(out2)
    ref2 = decoder_reference(x2, None, params2, dim=dim2, dim_out=dim_out2)
    assert out2.shape == (N, dim_out2, H, W)
    assert jnp.allclose(out2, ref2, atol=2e-2, rtol=2e-2), \
        float(jnp.max(jnp.abs(out2 - ref2)))

    print("KERNEL_OK")
</pallas_src>

<mosaic_0001>
module attributes {stable_mosaic.version = 11 : i64} {
  func.func @_decoder_kernel(%arg0: i32, %arg1: memref<1x8x290xf32, #tpu.memory_space<vmem>>, %arg2: memref<8x72xf32, #tpu.memory_space<vmem>>, %arg3: memref<8x72xf32, #tpu.memory_space<vmem>>, %arg4: memref<8x8xf32, #tpu.memory_space<vmem>>, %arg5: memref<1x8x1xf32, #tpu.memory_space<vmem>>, %arg6: memref<1x8x256xf32, #tpu.memory_space<vmem>>, %arg7: memref<8x290xf32, #tpu.memory_space<vmem>>, %arg8: memref<8x290xf32, #tpu.memory_space<vmem>>) attributes {dimension_semantics = [#tpu.dimension_semantics<parallel>], iteration_bounds = array<i64: 2>, scalar_prefetch = 0 : i64, scratch_operands = 2 : i64, tpu.core_type = #tpu.core_type<tc>, window_params = [{transform_indices = @transform_0, window_bounds = array<i64: 1, 8, 290>}, {pipeline_mode = #tpu.pipeline_mode<synchronous>, transform_indices = @transform_1, window_bounds = array<i64: 8, 72>}, {pipeline_mode = #tpu.pipeline_mode<synchronous>, transform_indices = @transform_2, window_bounds = array<i64: 8, 72>}, {pipeline_mode = #tpu.pipeline_mode<synchronous>, transform_indices = @transform_3, window_bounds = array<i64: 8, 8>}, {transform_indices = @transform_4, window_bounds = array<i64: 1, 8, 1>}, {transform_indices = @transform_5, window_bounds = array<i64: 1, 8, 256>}]} {
    %c0 = arith.constant 0 : index
    %c0_0 = arith.constant 0 : index
    %c0_1 = arith.constant 0 : index
    %0 = vector.load %arg1[%c0, %c0_0, %c0_1] : memref<1x8x290xf32, #tpu.memory_space<vmem>>, vector<1x8x290xf32>
    %1 = vector.shape_cast %0 : vector<1x8x290xf32> to vector<8x290xf32>
    %cst = arith.constant 0.000000e+00 : f32
    %2 = vector.broadcast %cst : f32 to vector<8x290xf32>
    %3 = arith.subf %2, %1 : vector<8x290xf32>
    %4 = math.exp %3 : vector<8x290xf32>
    %cst_2 = arith.constant 1.000000e+00 : f32
    %5 = vector.broadcast %cst_2 : f32 to vector<8x290xf32>
    %6 = arith.addf %5, %4 : vector<8x290xf32>
    %cst_3 = arith.constant 1.000000e+00 : f32
    %7 = vector.broadcast %cst_3 : f32 to vector<8x290xf32>
    %8 = arith.divf %7, %6 : vector<8x290xf32>
    %9 = arith.mulf %1, %8 : vector<8x290xf32>
    %cst_4 = arith.constant 1.67785239 : f32
    %10 = vector.broadcast %cst_4 : f32 to vector<8x290xf32>
    %11 = arith.mulf %9, %10 : vector<8x290xf32>
    %c0_5 = arith.constant 0 : index
    %c0_6 = arith.constant 0 : index
    %12 = vector.load %arg7[%c0_5, %c0_6] : memref<8x290xf32, #tpu.memory_space<vmem>>, vector<8x290xf32>
    tpu.vector_store %arg7[%c0_5, %c0_6], %11 {strides = array<i32>} : memref<8x290xf32, #tpu.memory_space<vmem>>, vector<8x290xf32>,
    %13 = vector.extract_strided_slice %1 {offsets = [0, 17], sizes = [8, 256], strides = [1, 1]} : vector<8x290xf32> to vector<8x256xf32>
    %c0_7 = arith.constant 0 : index
    %c0_8 = arith.constant 0 : index
    %14 = vector.load %arg4[%c0_7, %c0_8] : memref<8x8xf32, #tpu.memory_space<vmem>>, vector<8x8xf32>
    %cst_9 = arith.constant dense<0.000000e+00> : vector<8x256xf32>
    %15 = tpu.matmul %14, %13, %cst_9 {dimension_numbers = #tpu.dot_dimension_numbers<[1], [0], [0], [1], [0, 0, 1, 1], [], []>, precision = #tpu.contract_precision<fp32>} : vector<8x8xf32>, vector<8x256xf32>, vector<8x256xf32> -> vector<8x256xf32>
    %16 = tpu.iota {dimensions = array<i32: 1>} : vector<8x256xi32>
    %c16_i32 = arith.constant 16 : i32
    %c0_i32 = arith.constant 0 : i32
    %17 = arith.cmpi eq, %c16_i32, %c0_i32 : i32
    %c1_i32 = arith.constant 1 : i32
    %18 = arith.select %17, %c1_i32, %c16_i32 : i32
    %19 = vector.broadcast %18 : i32 to vector<8x256xi32>
    %20 = arith.remsi %16, %19 : vector<8x256xi32>
    %c0_i32_10 = arith.constant 0 : i32
    %21 = vector.broadcast %c0_i32_10 : i32 to vector<8x256xi32>
    %22 = arith.cmpi ne, %20, %21 : vector<8x256xi32>
    %c0_i32_11 = arith.constant 0 : i32
    %23 = vector.broadcast %c0_i32_11 : i32 to vector<8x256xi32>
    %24 = arith.cmpi slt, %20, %23 : vector<8x256xi32>
    %c0_i32_12 = arith.constant 0 : i32
    %25 = arith.cmpi slt, %18, %c0_i32_12 : i32
    %26 = vector.broadcast %25 : i1 to vector<8x256xi1>
    %27 = vector.broadcast %26 : vector<8x256xi1> to vector<8x256xi1>
    %28 = arith.xori %24, %27 : vector<8x256xi1>
    %29 = arith.andi %28, %22 : vector<8x256xi1>
    %30 = vector.broadcast %18 : i32 to vector<8x256xi32>
    %31 = arith.addi %20, %30 : vector<8x256xi32>
    %32 = arith.select %29, %31, %20 : vector<8x256xi1>, vector<8x256xi32>
    %c0_13 = arith.constant 0 : index
    %c0_14 = arith.constant 0 : index
    %33 = vector.load %arg7[%c0_13, %c0_14] : memref<8x290xf32, #tpu.memory_space<vmem>>, vector<8x256xf32>
    %c1_i32_15 = arith.constant 1 : i32
    %34 = vector.broadcast %c1_i32_15 : i32 to vector<8x256xi32>
    %35 = arith.cmpi sge, %32, %34 : vector<8x256xi32>
    %cst_16 = arith.constant 0.000000e+00 : f32
    %36 = vector.broadcast %cst_16 : f32 to vector<8x256xf32>
    %37 = arith.select %35, %33, %36 : vector<8x256xi1>, vector<8x256xf32>
    %c0_17 = arith.constant 0 : index
    %c1 = arith.constant 1 : index
    %38 = vector.load %arg7[%c0_17, %c1] : memref<8x290xf32, #tpu.memory_space<vmem>>, vector<8x256xf32>
    %c0_18 = arith.constant 0 : index
    %c2 = arith.constant 2 : index
    %39 = vector.load %arg7[%c0_18, %c2] : memref<8x290xf32, #tpu.memory_space<vmem>>, vector<8x256xf32>
    %c15_i32 = arith.constant 15 : i32
    %40 = vector.broadcast %c15_i32 : i32 to vector<8x256xi32>
    %41 = arith.cmpi slt, %32, %40 : vector<8x256xi32>
    %cst_19 = arith.constant 0.000000e+00 : f32
    %42 = vector.broadcast %cst_19 : f32 to vector<8x256xf32>
    %43 = arith.select %41, %39, %42 : vector<8x256xi1>, vector<8x256xf32>
    %c0_20 = arith.constant 0 : index
    %c16 = arith.constant 16 : index
    %44 = vector.load %arg7[%c0_20, %c16] : memref<8x290xf32, #tpu.memory_space<vmem>>, vector<8x256xf32>
    %c1_i32_21 = arith.constant 1 : i32
    %45 = vector.broadcast %c1_i32_21 : i32 to vector<8x256xi32>
    %46 = arith.cmpi sge, %32, %45 : vector<8x256xi32>
    %cst_22 = arith.constant 0.000000e+00 : f32
    %47 = vector.broadcast %cst_22 : f32 to vector<8x256xf32>
    %48 = arith.select %46, %44, %47 : vector<8x256xi1>, vector<8x256xf32>
    %c0_23 = arith.constant 0 : index
    %c17 = arith.constant 17 : index
    %49 = vector.load %arg7[%c0_23, %c17] : memref<8x290xf32, #tpu.memory_space<vmem>>, vector<8x256xf32>
    %c0_24 = arith.constant 0 : index
    %c18 = arith.constant 18 : index
    %50 = vector.load %arg7[%c0_24, %c18] : memref<8x290xf32, #tpu.memory_space<vmem>>, vector<8x256xf32>
    %c15_i32_25 = arith.constant 15 : i32
    %51 = vector.broadcast %c15_i32_25 : i32 to vector<8x256xi32>
    %52 = arith.cmpi slt, %32, %51 : vector<8x256xi32>
    %cst_26 = arith.constant 0.000000e+00 : f32
    %53 = vector.broadcast %cst_26 : f32 to vector<8x256xf32>
    %54 = arith.select %52, %50, %53 : vector<8x256xi1>, vector<8x256xf32>
    %c0_27 = arith.constant 0 : index
    %c32 = arith.constant 32 : index
    %55 = vector.load %arg7[%c0_27, %c32] : memref<8x290xf32, #tpu.memory_space<vmem>>, vector<8x256xf32>
    %c1_i32_28 = arith.constant 1 : i32
    %56 = vector.broadcast %c1_i32_28 : i32 to vector<8x256xi32>
    %57 = arith.cmpi sge, %32, %56 : vector<8x256xi32>
    %cst_29 = arith.constant 0.000000e+00 : f32
    %58 = vector.broadcast %cst_29 : f32 to vector<8x256xf32>
    %59 = arith.select %57, %55, %58 : vector<8x256xi1>, vector<8x256xf32>
    %c0_30 = arith.constant 0 : index
    %c33 = arith.constant 33 : index
    %60 = vector.load %arg7[%c0_30, %c33] : memref<8x290xf32, #tpu.memory_space<vmem>>, vector<8x256xf32>
    %c0_31 = arith.constant 0 : index
    %c34 = arith.constant 34 : index
    %61 = vector.load %arg7[%c0_31, %c34] : memref<8x290xf32, #tpu.memory_space<vmem>>, vector<8x256xf32>
    %c15_i32_32 = arith.constant 15 : i32
    %62 = vector.broadcast %c15_i32_32 : i32 to vector<8x256xi32>
    %63 = arith.cmpi slt, %32, %62 : vector<8x256xi32>
    %cst_33 = arith.constant 0.000000e+00 : f32
    %64 = vector.broadcast %cst_33 : f32 to vector<8x256xf32>
    %65 = arith.select %63, %61, %64 : vector<8x256xi1>, vector<8x256xf32>
    %66 = tpu.concatenate %37, %38, %43, %48, %49, %54, %59, %60, %65 in 0 : vector<8x256xf32>, vector<8x256xf32>, vector<8x256xf32>, vector<8x256xf32>, vector<8x256xf32>, vector<8x256xf32>, vector<8x256xf32>, vector<8x256xf32>, vector<8x256xf32> -> vector<72x256xf32>
    %c0_34 = arith.constant 0 : index
    %c0_35 = arith.constant 0 : index
    %67 = vector.load %arg2[%c0_34, %c0_35] : memref<8x72xf32, #tpu.memory_space<vmem>>, vector<8x72xf32>
    %cst_36 = arith.constant dense<0.000000e+00> : vector<8x256xf32>
    %68 = tpu.matmul %67, %66, %cst_36 {dimension_numbers = #tpu.dot_dimension_numbers<[1], [0], [0], [1], [0, 0, 1, 1], [], []>, precision = #tpu.contract_precision<fp32>} : vector<8x72xf32>, vector<72x256xf32>, vector<8x256xf32> -> vector<8x256xf32>
    %c0_37 = arith.constant 0 : index
    %c0_38 = arith.constant 0 : index
    %c0_39 = arith.constant 0 : index
    %69 = vector.load %arg5[%c0_37, %c0_38, %c0_39] : memref<1x8x1xf32, #tpu.memory_space<vmem>>, vector<1x8x1xf32>
    %70 = vector.shape_cast %69 : vector<1x8x1xf32> to vector<8x1xf32>
    %71 = vector.broadcast %70 : vector<8x1xf32> to vector<8x256xf32>
    %72 = arith.mulf %68, %71 : vector<8x256xf32>
    %cst_40 = arith.constant 0.000000e+00 : f32
    %73 = vector.broadcast %cst_40 : f32 to vector<8x256xf32>
    %74 = arith.subf %73, %72 : vector<8x256xf32>
    %75 = math.exp %74 : vector<8x256xf32>
    %cst_41 = arith.constant 1.000000e+00 : f32
    %76 = vector.broadcast %cst_41 : f32 to vector<8x256xf32>
    %77 = arith.addf %76, %75 : vector<8x256xf32>
    %cst_42 = arith.constant 1.000000e+00 : f32
    %78 = vector.broadcast %cst_42 : f32 to vector<8x256xf32>
    %79 = arith.divf %78, %77 : vector<8x256xf32>
    %80 = arith.mulf %72, %79 : vector<8x256xf32>
    %cst_43 = arith.constant 1.67785239 : f32
    %81 = vector.broadcast %cst_43 : f32 to vector<8x256xf32>
    %82 = arith.mulf %80, %81 : vector<8x256xf32>
    %cst_44 = arith.constant 0.000000e+00 : f32
    %83 = vector.broadcast %cst_44 : f32 to vector<8x290xf32>
    %c0_45 = arith.constant 0 : index
    %c0_46 = arith.constant 0 : index
    %84 = vector.load %arg8[%c0_45, %c0_46] : memref<8x290xf32, #tpu.memory_space<vmem>>, vector<8x290xf32>
    tpu.vector_store %arg8[%c0_45, %c0_46], %83 {strides = array<i32>} : memref<8x290xf32, #tpu.memory_space<vmem>>, vector<8x290xf32>,
    %c0_47 = arith.constant 0 : index
    %c17_48 = arith.constant 17 : index
    %85 = vector.load %arg8[%c0_47, %c17_48] : memref<8x290xf32, #tpu.memory_space<vmem>>, vector<8x256xf32>
    tpu.vector_store %arg8[%c0_47, %c17_48], %82 {strides = array<i32>} : memref<8x290xf32, #tpu.memory_space<vmem>>, vector<8x256xf32>,
    %86 = tpu.iota {dimensions = array<i32: 1>} : vector<8x256xi32>
    %c16_i32_49 = arith.constant 16 : i32
    %c0_i32_50 = arith.constant 0 : i32
    %87 = arith.cmpi eq, %c16_i32_49, %c0_i32_50 : i32
    %c1_i32_51 = arith.constant 1 : i32
    %88 = arith.select %87, %c1_i32_51, %c16_i32_49 : i32
    %89 = vector.broadcast %88 : i32 to vector<8x256xi32>
    %90 = arith.remsi %86, %89 : vector<8x256xi32>
    %c0_i32_52 = arith.constant 0 : i32
    %91 = vector.broadcast %c0_i32_52 : i32 to vector<8x256xi32>
    %92 = arith.cmpi ne, %90, %91 : vector<8x256xi32>
    %c0_i32_53 = arith.constant 0 : i32
    %93 = vector.broadcast %c0_i32_53 : i32 to vector<8x256xi32>
    %94 = arith.cmpi slt, %90, %93 : vector<8x256xi32>
    %c0_i32_54 = arith.constant 0 : i32
    %95 = arith.cmpi slt, %88, %c0_i32_54 : i32
    %96 = vector.broadcast %95 : i1 to vector<8x256xi1>
    %97 = vector.broadcast %96 : vector<8x256xi1> to vector<8x256xi1>
    %98 = arith.xori %94, %97 : vector<8x256xi1>
    %99 = arith.andi %98, %92 : vector<8x256xi1>
    %100 = vector.broadcast %88 : i32 to vector<8x256xi32>
    %101 = arith.addi %90, %100 : vector<8x256xi32>
    %102 = arith.select %99, %101, %90 : vector<8x256xi1>, vector<8x256xi32>
    %c0_55 = arith.constant 0 : index
    %c0_56 = arith.constant 0 : index
    %103 = vector.load %arg8[%c0_55, %c0_56] : memref<8x290xf32, #tpu.memory_space<vmem>>, vector<8x256xf32>
    %c1_i32_57 = arith.constant 1 : i32
    %104 = vector.broadcast %c1_i32_57 : i32 to vector<8x256xi32>
    %105 = arith.cmpi sge, %102, %104 : vector<8x256xi32>
    %cst_58 = arith.constant 0.000000e+00 : f32
    %106 = vector.broadcast %cst_58 : f32 to vector<8x256xf32>
    %107 = arith.select %105, %103, %106 : vector<8x256xi1>, vector<8x256xf32>
    %c0_59 = arith.constant 0 : index
    %c1_60 = arith.constant 1 : index
    %108 = vector.load %arg8[%c0_59, %c1_60] : memref<8x290xf32, #tpu.memory_space<vmem>>, vector<8x256xf32>
    %c0_61 = arith.constant 0 : index
    %c2_62 = arith.constant 2 : index
    %109 = vector.load %arg8[%c0_61, %c2_62] : memref<8x290xf32, #tpu.memory_space<vmem>>, vector<8x256xf32>
    %c15_i32_63 = arith.constant 15 : i32
    %110 = vector.broadcast %c15_i32_63 : i32 to vector<8x256xi32>
    %111 = arith.cmpi slt, %102, %110 : vector<8x256xi32>
    %cst_64 = arith.constant 0.000000e+00 : f32
    %112 = vector.broadcast %cst_64 : f32 to vector<8x256xf32>
    %113 = arith.select %111, %109, %112 : vector<8x256xi1>, vector<8x256xf32>
    %c0_65 = arith.constant 0 : index
    %c16_66 = arith.constant 16 : index
    %114 = vector.load %arg8[%c0_65, %c16_66] : memref<8x290xf32, #tpu.memory_space<vmem>>, vector<8x256xf32>
    %c1_i32_67 = arith.constant 1 : i32
    %115 = vector.broadcast %c1_i32_67 : i32 to vector<8x256xi32>
    %116 = arith.cmpi sge, %102, %115 : vector<8x256xi32>
    %cst_68 = arith.constant 0.000000e+00 : f32
    %117 = vector.broadcast %cst_68 : f32 to vector<8x256xf32>
    %118 = arith.select %116, %114, %117 : vector<8x256xi1>, vector<8x256xf32>
    %c0_69 = arith.constant 0 : index
    %c17_70 = arith.constant 17 : index
    %119 = vector.load %arg8[%c0_69, %c17_70] : memref<8x290xf32, #tpu.memory_space<vmem>>, vector<8x256xf32>
    %c0_71 = arith.constant 0 : index
    %c18_72 = arith.constant 18 : index
    %120 = vector.load %arg8[%c0_71, %c18_72] : memref<8x290xf32, #tpu.memory_space<vmem>>, vector<8x256xf32>
    %c15_i32_73 = arith.constant 15 : i32
    %121 = vector.broadcast %c15_i32_73 : i32 to vector<8x256xi32>
    %122 = arith.cmpi slt, %102, %121 : vector<8x256xi32>
    %cst_74 = arith.constant 0.000000e+00 : f32
    %123 = vector.broadcast %cst_74 : f32 to vector<8x256xf32>
    %124 = arith.select %122, %120, %123 : vector<8x256xi1>, vector<8x256xf32>
    %c0_75 = arith.constant 0 : index
    %c32_76 = arith.constant 32 : index
    %125 = vector.load %arg8[%c0_75, %c32_76] : memref<8x290xf32, #tpu.memory_space<vmem>>, vector<8x256xf32>
    %c1_i32_77 = arith.constant 1 : i32
    %126 = vector.broadcast %c1_i32_77 : i32 to vector<8x256xi32>
    %127 = arith.cmpi sge, %102, %126 : vector<8x256xi32>
    %cst_78 = arith.constant 0.000000e+00 : f32
    %128 = vector.broadcast %cst_78 : f32 to vector<8x256xf32>
    %129 = arith.select %127, %125, %128 : vector<8x256xi1>, vector<8x256xf32>
    %c0_79 = arith.constant 0 : index
    %c33_80 = arith.constant 33 : index
    %130 = vector.load %arg8[%c0_79, %c33_80] : memref<8x290xf32, #tpu.memory_space<vmem>>, vector<8x256xf32>
    %c0_81 = arith.constant 0 : index
    %c34_82 = arith.constant 34 : index
    %131 = vector.load %arg8[%c0_81, %c34_82] : memref<8x290xf32, #tpu.memory_space<vmem>>, vector<8x256xf32>
    %c15_i32_83 = arith.constant 15 : i32
    %132 = vector.broadcast %c15_i32_83 : i32 to vector<8x256xi32>
    %133 = arith.cmpi slt, %102, %132 : vector<8x256xi32>
    %cst_84 = arith.constant 0.000000e+00 : f32
    %134 = vector.broadcast %cst_84 : f32 to vector<8x256xf32>
    %135 = arith.select %133, %131, %134 : vector<8x256xi1>, vector<8x256xf32>
    %136 = tpu.concatenate %107, %108, %113, %118, %119, %124, %129, %130, %135 in 0 : vector<8x256xf32>, vector<8x256xf32>, vector<8x256xf32>, vector<8x256xf32>, vector<8x256xf32>, vector<8x256xf32>, vector<8x256xf32>, vector<8x256xf32>, vector<8x256xf32> -> vector<72x256xf32>
    %c0_85 = arith.constant 0 : index
    %c0_86 = arith.constant 0 : index
    %137 = vector.load %arg3[%c0_85, %c0_86] : memref<8x72xf32, #tpu.memory_space<vmem>>, vector<8x72xf32>
    %cst_87 = arith.constant dense<0.000000e+00> : vector<8x256xf32>
    %138 = tpu.matmul %137, %136, %cst_87 {dimension_numbers = #tpu.dot_dimension_numbers<[1], [0], [0], [1], [0, 0, 1, 1], [], []>, precision = #tpu.contract_precision<fp32>} : vector<8x72xf32>, vector<72x256xf32>, vector<8x256xf32> -> vector<8x256xf32>
    %cst_88 = arith.constant 0.919145047 : f32
    %139 = vector.broadcast %cst_88 : f32 to vector<8x256xf32>
    %140 = arith.mulf %139, %138 : vector<8x256xf32>
    %cst_89 = arith.constant 0.393919289 : f32
    %141 = vector.broadcast %cst_89 : f32 to vector<8x256xf32>
    %142 = arith.mulf %141, %15 : vector<8x256xf32>
    %143 = arith.addf %140, %142 : vector<8x256xf32>
    %c0_90 = arith.constant 0 : index
    %c0_91 = arith.constant 0 : index
    %c0_92 = arith.constant 0 : index
    %144 = vector.load %arg6[%c0_90, %c0_91, %c0_92] : memref<1x8x256xf32, #tpu.memory_space<vmem>>, vector<1x8x256xf32>
    %145 = vector.shape_cast %144 : vector<1x8x256xf32> to vector<8x256xf32>
    %146 = vector.shape_cast %143 : vector<8x256xf32> to vector<1x8x256xf32>
    tpu.vector_store %arg6[%c0_90, %c0_91, %c0_92], %146 {strides = array<i32>} : memref<1x8x256xf32, #tpu.memory_space<vmem>>, vector<1x8x256xf32>,
    return
  }
  func.func @transform_0(%arg0: i32) -> (i32, i32, i32) {
    %c0_i32 = arith.constant 0 : i32
    %c0_i32_0 = arith.constant 0 : i32
    %c0_i32_1 = arith.constant 0 : i32
    return %arg0, %c0_i32, %c0_i32_0 : i32, i32, i32
  }
  func.func @transform_1(%arg0: i32) -> (i32, i32) {
    %c0_i32 = arith.constant 0 : i32
    %c0_i32_0 = arith.constant 0 : i32
    %c0_i32_1 = arith.constant 0 : i32
    return %c0_i32, %c0_i32_0 : i32, i32
  }
  func.func @transform_2(%arg0: i32) -> (i32, i32) {
    %c0_i32 = arith.constant 0 : i32
    %c0_i32_0 = arith.constant 0 : i32
    %c0_i32_1 = arith.constant 0 : i32
    return %c0_i32, %c0_i32_0 : i32, i32
  }
  func.func @transform_3(%arg0: i32) -> (i32, i32) {
    %c0_i32 = arith.constant 0 : i32
    %c0_i32_0 = arith.constant 0 : i32
    %c0_i32_1 = arith.constant 0 : i32
    return %c0_i32, %c0_i32_0 : i32, i32
  }
  func.func @transform_4(%arg0: i32) -> (i32, i32, i32) {
    %c0_i32 = arith.constant 0 : i32
    %c0_i32_0 = arith.constant 0 : i32
    %c0_i32_1 = arith.constant 0 : i32
    return %arg0, %c0_i32, %c0_i32_0 : i32, i32, i32
  }
  func.func @transform_5(%arg0: i32) -> (i32, i32, i32) {
    %c0_i32 = arith.constant 0 : i32
    %c0_i32_0 = arith.constant 0 : i32
    %c0_i32_1 = arith.constant 0 : i32
    return %arg0, %c0_i32, %c0_i32_0 : i32, i32, i32
  }
}

</mosaic_0001>

<bundles_post_ra>
// kernel: tpu_custom_call.1
= control target key start
LH: loop header
LB: loop body
LE: loop exit
PB: predicated region body
PF: predicated region fallthrough
CT: control target
= control target key end

     0   :  { %10 = vsyncpa [#allocation5], 0  ;;  %s3874_s0 = inlined_call_operand.hbm [shape: f32[2,8,290], index: 0, kind: input, shape index: {}]   ;;  %s3875_s1 = inlined_call_operand.vmem [shape: f32[8,72], index: 1, kind: input, shape index: {}]   ;;  %s3876_s2 = inlined_call_operand.vmem [shape: f32[8,72], index: 2, kind: input, shape index: {}]   ;;  %s3877_s3 = inlined_call_operand.vmem [shape: f32[8,8], index: 3, kind: input, shape index: {}]   ;;  %s3878_s4 = inlined_call_operand.vmem [shape: f32[2,8,1], index: 4, kind: input, shape index: {}]   ;;  %s3879_s5 = inlined_call_operand.hbm [shape: f32[2,8,256], index: 5, kind: output, shape index: {}]  }
   0x1   :  { %12 = vsyncpa [#allocation5 + $0x1], 0 }
   0x2   :  { %13 = vsyncpa [#allocation6], 0 }
   0x3   :  { %15 = vsyncpa [#allocation6 + $0x1], 0  ;;  %s2967_s18 = smov 0   ;;  %s2969_s19 = smov 0  }
   0x4   :  { %s2971_s20 = smov 0   ;;  %s2973_s21 = smov 0  }
   0x5 LB: > { %s2988_s22 = sadd.s32 4294967295, %s2922_s21   ;;  %s2509_s23 = sadd.s32 4294967294, %s2922_s21   ;;  %s2922_s21 = sphi %s2973_s21, %s3931_s21   ;;  %s2918_s20 = sphi %s2971_s20, %s3930_s20   ;;  %s2914_s19 = sphi %s2969_s19, %s3929_s19   ;;  %s2910_s18 = sphi %s2967_s18, %s3928_s18  }
   0x6   : > { %s2992_s24 = sadd.s32 1, %s2922_s21   ;;  %s28_s25 = sadd.s32 1, %s2918_s20 }
   0x7   : > { %s25_s26 = ssub.s32 %s2922_s21, %s2992_s24  ;;  %p35_p0 = scmp.ne.s32.totalorder %s2918_s20, %s2914_s19 }
   0x8   : > { %p26_p1 = scmp.eq.s32.totalorder %s25_s26, 0  ;;  %p36_p2 = scmp.eq.s32.totalorder %s2922_s21, 0 }
   0x9   : > { %p41_p3 = scmp.ne.s32.totalorder %s2914_s19, %s2910_s18  ;;  %p42_p4 = scmp.eq.s32.totalorder %s2988_s22, 0 }
   0xa   : > { %s3004_s27 = scalar_select %p26_p1, %s2918_s20, %s28_s25  }
   0xb   : > { %p37_p5 = por %p36_p2, %p35_p0  ;;  %p3006_p6 = por %p42_p4, %p41_p3 }
   0xc   : > { %p154_p7 = scmp.eq.s32.totalorder %s2988_s22, 1  ;;  %p160_p8 = scmp.eq.s32.totalorder %s2509_s23, 1 }
   0xd   : > { %p2759_p10 = scmp.lt.s32.totalorder %s2922_s21, 2  ;;  %s189_s6 = sand.u32 1, %s2918_s20  }
   0xe   : > { %p3013_p11 = por %p154_p7, %p35_p0  ;;  %p3017_p12 = por %p160_p8, %p41_p3 }
   0xf   : > { %s2745_s7 = smul.u32 384, %s2922_s21  ;;  %p3028_p13 = pnand %p2759_p10, %p37_p5 }
  0x10   : > { %s3897_s29 = scalar_select %p3013_p11, 1, 0 }
  0x11   : > { %s3898_s30 = scalar_select %p3017_p12, 1, 0 }
  0x12   : > { %s2744_s8 = smul.u32 24, %s189_s6  ;;  %s3026_s11 = scalar_lea.hbm %s3874_s0, %s2745_s7 }
  0x13   : > { %s190_s15 = scalar_lea.sflag [#allocation5], %s189_s6  ;;  %s2826_s16 = scalar_lea.hbm %s3026_s11, 384 }
  0x14   : > { %s193_s13 = scalar_lea.vmem [#allocation4], %s2744_s8  ;;  %p2827_p2 = scmp.ne.s32.totalorder %s3026_s11, %s2826_s16 }
  0x15   : > { %s201_s14 = sshll.u32 %s193_s13, 4  ;;  %p2828_p3 = pneg %p3028_p13  ;;  %s3033_s14 = int_to_ptr.vmem [resolvable:$true] %s201_s14 }
  0x16   : > { %s2831_s25 = scalar_lea.hbm %s3874_s0, 768  ;;  %p2832_p7 = scmp.lt.u32.totalorder %s3026_s11, %s3874_s0 }
  0x17   : > { %p2829_p4 = pnand %p2828_p3, %p2827_p2  ;;  %p2833_p8 = scmp.lt.u32.totalorder %s2831_s25, %s2826_s16 }
  0x18   : > { %p2835_p9 = scmp.lt.u32.totalorder %s2826_s16, %s3026_s11 }
  0x19   : > { %p2830_p5 = pneg %p2829_p4  ;;  %p2834_p10 = por %p2833_p8, %p2832_p7 }
  0x1b   : > { %p2836_p0 = por %p2835_p9, %p2834_p10 }
  0x1d   : > { %p2837_p1 = pnand %p2836_p0, %p2830_p5 }
  0x1f   : > { %2840 = shalt.err (!%p2837_p1)
}
  0x20   : > { %s2841_s6 = scalar_lea.vmem %s3033_s14, 384  ;;  %s2924_s8 = smov [#allocation4]  }
  0x21   : > { %p2842_p2 = scmp.ne.s32.totalorder %s3033_s14, %s2841_s6  ;;  %s2846_s9 = sshll.u32 %s2924_s8, 4  ;;  %s2847_s9 = int_to_ptr.vmem [resolvable:$false] %s2846_s9 }
  0x22   : > { %s2848_s10 = scalar_lea.vmem %s2847_s9, 768  ;;  %p2849_p11 = scmp.lt.s32.totalorder %s3033_s14, %s2847_s9 }
  0x23   : > { %p2844_p4 = pnand %p2842_p2, %p2828_p3  ;;  %p2850_p7 = scmp.lt.s32.totalorder %s2848_s10, %s2841_s6 }
  0x25   : > { %p2845_p12 = pneg %p2844_p4  ;;  %p2851_p8 = por %p2850_p7, %p2849_p11 }
  0x27   : > { %p2852_p9 = pnand %p2851_p8, %p2845_p12 }
  0x29   : > { %2855 = shalt.err (!%p2852_p9)
}
  0x2a   : > { %2754 = dma.hbm_to_vmem [thread:$0]  (!%p3028_p13), %s3026_s11, 384, %s3033_s14, %s190_s15  }
  0x2b   : > { %p3900_p0 = scmp.lt.s32.totalorder %s2922_s21, 3  ;;  %p3901_p1 = scmp.ge.s32.totalorder %s2922_s21, 1 }
  0x2d   : > { %p214_p3 = pnand %p3901_p1, %p3900_p0 }
  0x2e   : > { %s3066_s13 = sand.u32 (!%p214_p3), 1, %s2914_s19  }
  0x2f   : > { %217 = sbr.rel (%p214_p3) target bundleno = 1207 (0x4b7), region = 40  ;;  %s220_s17 = scalar_lea.sflag (!%p214_p3), [#allocation5], %s3066_s13 }
  0x30   : > { %s2746_s16 = smul.u32 (!%p214_p3), 24, %s3066_s13 }
  0x32   : > { %s223_s23 = scalar_lea.vmem (!%p214_p3), [#allocation4], %s2746_s16 }
  0x36   : > { %2901 = dma.done.wait (%p3006_p6), %s220_s17, 384  }
  0x37   : > { %2903 = vsyncadd (%p3006_p6), %s220_s17, 4294966912  ;;  %vm287_vm0 = vcmask 277504   ;;  %v2925_v0 = vmov 0.0   ;;  %v259_v1 = vld [vmem:[%s223_s23 + $0x8] sm:$0xff]  ;;  %v260_v2 = vld [vmem:[%s223_s23 + $0x10] sm:$0xff]  ;;  %s2926_s11 = smov 111   ;;  %v773_v48 = vlaneseq }
  0x38   : > { %374 = vmatprep.mubr.f32.mxu1 %v2925_v0  ;;  %1611 = vst [vmem:[#allocation3] sm:$0xff] %v2925_v0  ;;  %1613 = vst.msk [vmem:[#allocation3 + $0x10] sm:$0xff] %vm287_vm0, %v2925_v0  ;;  %611 = vmatprep.mubr.f32.mxu0 %v2925_v0  ;;  %v258_v3 = vld [vmem:[%s223_s23] sm:$0xff]  ;;  %v262_v4 = vsub.f32 0.0, %v259_v1  ;;  %v263_v5 = vsub.f32 0.0, %v260_v2  ;;  %s2927_s28 = smov 127  }
  0x39   : > { %295 = vrot.lane.b32.xlu0 %v259_v1, %s2926_s11  ;;  %293 = vrot.lane.b32.xlu1 %v258_v3, %s2926_s11  ;;  %v261_v6 = vsub.f32 0.0, %v258_v3  ;;  %s2928_s12 = smov 126   ;;  %s2929_s14 = smov 112   ;;  %v289_v26 = vld [vmem:[%s3877_s3] sm:$0xff]  ;;  %vm304_vm1 = vcmask 64512   ;;  %vm299_vm2 = vcmask 908288  }
  0x3a   : > { %v266_v7 = vmul.f32 1.442695, %v262_v4  ;;  %v268_v8 = vmul.f32 1.442695, %v263_v5  ;;  %s2930_s15 = smov 110   ;;  %s2931_s25 = smov 96  }
  0x3b   : > { %v264_v9 = vmul.f32 1.442695, %v261_v6  ;;  %s2932_s26 = smov 95   ;;  %s2933_s7 = smov 94   ;;  %v306_v27 = vsel %vm304_vm1, %v289_v26, 0  ;;  %v774_v49 = vand.u32 127, %v773_v48 }
  0x3c   : > { %2806 = vpow2.f32 %v266_v7  ;;  %v375_v28 = vand.u32 4294901760, %v306_v27  ;;  %vm883_vm4 = vcmask 1039360   ;;  %vm818_vm6 = vcmask 1031168   ;;  %p254_p6 = scmp.lt.s32.totalorder %s2988_s22, 1  ;;  %p3925_p12 = scmp.ne.s32.totalorder %s3897_s29, 0 }
  0x3d   : > { %297 = vrot.lane.b32.xlu0 %v260_v2, %s2926_s11  ;;  %2808 = vpow2.f32 %v268_v8  ;;  %v775_v50 = vadd.s32 128, %v774_v49  ;;  %v780_v53 = vand.u32 15, %v774_v49  ;;  %vm831_vm8 = vcmask 916480  }
  0x3e   : > { %2810 = vpow2.f32 %v264_v9  ;;  %v376_v29 = vsub.f32 %v306_v27, %v375_v28  ;;  %s255_s9 = scalar_select %p254_p6, %s2988_s22, 1  ;;  %vm910_vm10 = vcmask 588800   ;;  %vm844_vm11 = vcmask 900096  }
  0x3f   : > { %v787_v51 = vand.u32 15, %v775_v50  ;;  %vm3142_vm5 = vcmp.ge.s32.totalorder %v780_v53, 1  ;;  %vm3189_vm9 = vcmp.lt.s32.totalorder %v780_v53, 15  ;;  %vm857_vm12 = vcmask 785408  }
  0x40   : > { %v377_v30 = vand.u32 4294901760, %v376_v29  ;;  %s2515_s17 = sshll.u32 %s255_s9, 3  ;;  %vm904_vm13 = vcmask 777216   ;;  %vm870_vm14 = vcmask 769024   ;;  %s2935_s9 = smov 17   ;;  %vm1625_vm15 = vcmask 1047688  }
  0x41   : > { %vm3138_vm3 = vcmp.ge.s32.totalorder %v787_v51, 1  ;;  %vm3171_vm7 = vcmp.lt.s32.totalorder %v787_v51, 15  ;;  %s257_s8 = scalar_lea.vmem %s3878_s4, %s2515_s17  ;;  %s2936_s17 = smov [#allocation7]  }
  0x42   : > { %v378_v35 = vsub.f32 %v376_v29, %v377_v30  ;;  %s2860_s23 = sshll.u32 %s2936_s17, 4  ;;  %s2861_s23 = int_to_ptr.vmem [resolvable:$false] %s2860_s23 }
  0x43   : > { %s2862_s6 = scalar_lea.vmem %s2861_s23, 512 }
  0x44   : > { %v379_v41 = vand.u32 4294901760, %v378_v35 }
  0x46   : > { %v2807_v10 = vpop.eup %2806 }
  0x47   : > { %v2809_v11 = vpop.eup %2808  ;;  %v271_v12 = vadd.f32 1.0, %v2807_v10 }
  0x48   : > { %v2811_v13 = vpop.eup %2810  ;;  %v272_v14 = vadd.f32 1.0, %v2809_v11 }
  0x49   : > { %2812 = vrcp.f32 %v271_v12  ;;  %v270_v15 = vadd.f32 1.0, %v2811_v13 }
  0x4a   : > { %2814 = vrcp.f32 %v272_v14 }
  0x4b   : > { %2816 = vrcp.f32 %v270_v15 }
  0x53   : > { %v2813_v16 = vpop.eup %2812 }
  0x54   : > { %v2815_v17 = vpop.eup %2814  ;;  %v280_v18 = vmul.f32 %v2813_v16, %v259_v1 }
  0x55   : > { %v2817_v19 = vpop.eup %2816  ;;  %v281_v20 = vmul.f32 %v2815_v17, %v260_v2 }
  0x56   : > { %v3082_v21 = vmul.f32 1.6778524, %v280_v18  ;;  %v279_v22 = vmul.f32 %v2817_v19, %v258_v3 }
  0x57   : > { %v284_v23 = vmul.f32 1.6778524, %v281_v20 }
  0x58   : > { %v3084_v24 = vmul.f32 1.6778524, %v279_v22  ;;  %879 = vrot.lane.b32.xlu1 %v3082_v21, %s2927_s28  ;;  %v3149_v57 = vsel %vm3138_vm3, %v3082_v21, 0.0 }
  0x59   : > { %288 = vst.msk [vmem:[#allocation2 + $0x10] sm:$0xff] %vm287_vm0, %v284_v23  ;;  %v914_v61 = vand.u32 4294901760, %v3149_v57  ;;  %vm1620_vm0 = vcmask 138240  }
  0x5a   : > { %v804_v59 = vsel %vm3142_vm5, %v3084_v24, 0.0 }
  0x5b   : > { %v916_v2 = vand.u32 4294901760, %v804_v59 }
  0x5c   : > { %877 = vrot.lane.b32.xlu1 %v3084_v24, %s2927_s28 }
  0x60   : > { %v806_v25 = vld [vmem:[#allocation2 + $0x10] sm:$0xff] }
  0x61   : > { %881 = vrot.lane.b32.xlu0 %v806_v25, %s2927_s28  ;;  %816 = vrot.lane.b32.xlu1 %v806_v25, %s2928_s12 }
  0x65   : > { %814 = vrot.lane.b32.xlu0 %v3082_v21, %s2928_s12  ;;  %829 = vrot.lane.b32.xlu1 %v806_v25, %s2929_s14 }
  0x69   : > { %827 = vrot.lane.b32.xlu0 %v3082_v21, %s2929_s14  ;;  %825 = vrot.lane.b32.xlu1 %v3084_v24, %s2929_s14 }
  0x6d   : > { %812 = vrot.lane.b32.xlu0 %v3084_v24, %s2928_s12  ;;  %842 = vrot.lane.b32.xlu1 %v806_v25, %s2930_s15 }
  0x71   : > { %840 = vrot.lane.b32.xlu0 %v3082_v21, %s2930_s15  ;;  %890 = vrot.lane.b32.xlu1 %v3082_v21, %s2926_s11 }
  0x75   : > { %838 = vrot.lane.b32.xlu0 %v3084_v24, %s2930_s15  ;;  %888 = vrot.lane.b32.xlu1 %v3084_v24, %s2926_s11 }
  0x79   : > { %892 = vrot.lane.b32.xlu0 %v806_v25, %s2926_s11  ;;  %855 = vrot.lane.b32.xlu1 %v806_v25, %s2931_s25 }
  0x7d   : > { %853 = vrot.lane.b32.xlu0 %v3082_v21, %s2931_s25  ;;  %900 = vrot.lane.b32.xlu1 %v3082_v21, %s2932_s26 }
  0x81   : > { %851 = vrot.lane.b32.xlu0 %v3084_v24, %s2931_s25  ;;  %898 = vrot.lane.b32.xlu1 %v3084_v24, %s2932_s26 }
  0x85   : > { %902 = vrot.lane.b32.xlu0 %v806_v25, %s2932_s26  ;;  %868 = vrot.lane.b32.xlu1 %v806_v25, %s2933_s7 }
  0x89   : > { %866 = vrot.lane.b32.xlu0 %v3082_v21, %s2933_s7 }
  0x8d   : > { %864 = vrot.lane.b32.xlu0 %v3084_v24, %s2933_s7  ;;  %v2934_v24 = vmov 0  }
  0x8e   : > { %2804 = vset.pattern.permute.xlu1 %v2934_v24  ;;  %2805 = vset.pattern.permute.xlu0 %v2934_v24 }
  0xab   : > { %v296_v31 = vpop.permute.xlu0 %295  ;;  %v294_v32 = vpop.permute.xlu1 %293 }
  0xac   : > { %v300_v33 = vsel %vm299_vm2, %v294_v32, %v296_v31  ;;  %v1587_v32 = vld [vmem:[%s257_s8] sm:$0xff] }
  0xad   : > { %v310_v34 = vand.u32 4294901760, %v300_v33  ;;  %1590 = vperm.xlu1 %2804, %v1587_v32  }
  0xaf   : > { %v298_v36 = vpop.permute.xlu0 %297  ;;  %v393_v37 = vsub.f32 %v300_v33, %v310_v34 }
  0xb0   : > { %v301_v38 = vsel %vm299_vm2, %v296_v31, %v298_v36 }
  0xb1   : > { %v308_v39 = vand.u32 4294901760, %v301_v38  ;;  %v394_v40 = vand.u32 4294901760, %v393_v37 }
  0xb3   : > { %v387_v42 = vsub.f32 %v301_v38, %v308_v39  ;;  %309 = vmatprep.subr.mxu1 %v308_v39  ;;  %546 = vmatprep.subr.mxu0 %v308_v39  ;;  %v395_v43 = vsub.f32 %v393_v37, %v394_v40 }
  0xb4   : > { %311 = vmatpush1.msra.mxu1 %v310_v34  ;;  %548 = vmatpush1.msra.mxu0 %v310_v34 }
  0xb5   : > { %380 = vmatmul.mubr.f32.vlgmr.msra.gmra.mrb[0].mxu1 %v379_v41  ;;  %615 = vmatmul.mubr.f32.vlgmr.msra.gmra.mrb[0].mxu0 %v377_v30  ;;  %v388_v44 = vand.u32 4294901760, %v387_v42  ;;  %v396_v46 = vand.u32 4294901760, %v395_v43  ;;  %v909_v30 = vld [vmem:[%s3875_s1] sm:$0xff]  ;;  %v3238_v43 = vsub.f32 %v3149_v57, %v914_v61 }
  0xb6   : > { %460 = vmatprep.mubr.f32.mxu1 %v2925_v0  ;;  %691 = vmatprep.mubr.f32.mxu0 %v2925_v0  ;;  %v912_v33 = vsel %vm910_vm10, %v909_v30, 0 }
  0xb7   : > { %v389_v45 = vsub.f32 %v387_v42, %v388_v44  ;;  %624 = vmatprep.subr.mxu0 %v388_v44 }
  0xb8   : > { %628 = vmatpush1.msra.mxu0 %v394_v40  ;;  %v3231_v40 = vand.u32 4294901760, %v912_v33 }
  0xb9   : > { %v390_v47 = vand.u32 4294901760, %v389_v45  ;;  %700 = vmatprep.subr.mxu0 %v308_v39 }
  0xba   : > { %v3243_v51 = vsub.f32 %v912_v33, %v3231_v40 }
  0xbb   : > { %391 = vmatprep.subr.mxu1 %v390_v47 }
  0xbc   : > { %397 = vmatpush1.msra.mxu1 %v396_v46 }
  0xbd   : > { %470 = vmatprep.subr.mxu1 %v387_v42  ;;  %462 = vmatmul.mubr.f32.vlgmr.msra.gmra.mrb[0].mxu1 %v375_v28  ;;  %v3235_v42 = vsub.f32 %v804_v59, %v916_v2 }
  0xbe   : > { %473 = vmatpush1.msra.mxu1 %v393_v37  ;;  %693 = vmatmul.mubr.f32.vlgmr.msra.gmra.mrb[0].mxu0 %v375_v28 }
  0xbf   : > { %702 = vmatpush1.msra.mxu0 %v310_v34  ;;  %536 = vmatprep.mubr.f32.mxu1 %v2925_v0  ;;  %v1016_v57 = vand.u32 4294901760, %v3235_v42 }
  0xc0   : > { %765 = vmatprep.mubr.f32.mxu0 %v2925_v0 }
  0xc5   : > { %539 = vmatmul.mubr.f32.vlgmr.msra.gmra.mrb[0].mxu1 %v376_v29 }
  0xc6   : > { %767 = vmatmul.mubr.f32.vlgmr.msra.gmra.mrb[0].mxu0 %v375_v28  ;;  %996 = vmatprep.mubr.f32.mxu1 %v2925_v0 }
  0xc7   : > { %1813 = vmatprep.mubr.f32.mxu0 %v2925_v0 }
  0xca   : > { %v880_v52 = vpop.permute.xlu1 %879 }
  0xce   : > { %v878_v55 = vpop.permute.xlu1 %877 }
  0xcf   : > { %v3155_v60 = vsel %vm883_vm4, %v878_v55, %v880_v52 }
  0xd0   : > { %v920_v3 = vand.u32 4294901760, %v3155_v60 }
  0xd2   : > { %v3169_v7 = vpack.c.bf16 %v920_v3, %v916_v2  ;;  %v3252_v59 = vsub.f32 %v3155_v60, %v920_v3 }
  0xd3   : > { %v882_v58 = vpop.permute.xlu0 %881  ;;  %v817_v62 = vpop.permute.xlu1 %816 }
  0xd4   : > { %v3159_v63 = vsel %vm883_vm4, %v880_v52, %v882_v58  ;;  %v1010_v58 = vand.u32 4294901760, %v3238_v43 }
  0xd5   : > { %v918_v1 = vand.u32 4294901760, %v3159_v63 }
  0xd6   : > { %v3268_v3 = vsub.f32 %v3238_v43, %v1010_v58 }
  0xd7   : > { %v815_v4 = vpop.permute.xlu0 %814  ;;  %v3165_v5 = vpack.c.bf16 %v918_v1, %v914_v61  ;;  %v830_v6 = vpop.permute.xlu1 %829  ;;  %v3261_v2 = vsub.f32 %v3159_v63, %v918_v1  ;;  %v1028_v63 = vand.u32 4294901760, %v3252_v59 }
  0xd8   : > { %v820_v9 = vsel %vm818_vm6, %v815_v4, %v817_v62  ;;  %v999_v62 = vand.u32 4294901760, %v3243_v51 }
  0xd9   : > { %2523 = vmatprep.subr.bf16.mxu1 %v3165_v5  ;;  %v3180_v11 = vsel %vm3171_vm7, %v820_v9, 0.0  ;;  %v3273_v9 = vsub.f32 %v3235_v42, %v1016_v57 }
  0xda   : > { %2525 = vmatpush1.bf16.msra.mxu1 %v3169_v7  ;;  %v922_v16 = vand.u32 4294901760, %v3180_v11 }
  0xdb   : > { %v828_v10 = vpop.permute.xlu0 %827  ;;  %v826_v12 = vpop.permute.xlu1 %825 }
  0xdc   : > { %v833_v13 = vsel %vm831_vm8, %v828_v10, %v830_v6  ;;  %v832_v14 = vsel %vm831_vm8, %v826_v12, %v828_v10 }
  0xdd   : > { %v3186_v15 = vsel %vm3138_vm3, %v833_v13, 0.0  ;;  %v3196_v20 = vsel %vm3142_vm5, %v832_v14, 0.0  ;;  %v3288_v14 = vsub.f32 %v3243_v51, %v999_v62 }
  0xde   : > { %v926_v18 = vand.u32 4294901760, %v3186_v15  ;;  %v928_v27 = vand.u32 4294901760, %v3196_v20 }
  0xdf   : > { %v813_v19 = vpop.permute.xlu0 %812  ;;  %v843_v21 = vpop.permute.xlu1 %842 }
  0xe0   : > { %v819_v22 = vsel %vm818_vm6, %v813_v19, %v815_v4  ;;  %v3204_v23 = vpack.c.bf16 %v926_v18, %v922_v16  ;;  %v3280_v10 = vsub.f32 %v3186_v15, %v926_v18  ;;  %v1022_v19 = vand.u32 4294901760, %v3261_v2 }
  0xe1   : > { %v3208_v25 = vsel %vm3189_vm9, %v819_v22, 0.0  ;;  %v3297_v15 = vsub.f32 %v3196_v20, %v928_v27 }
  0xe2   : > { %v924_v26 = vand.u32 4294901760, %v3208_v25  ;;  %2527 = vmatprep.subr.bf16.mxu1 %v3204_v23  ;;  %v3883_v30 = vand.u32 4294901760, %v3280_v10 }
  0xe3   : > { %v841_v28 = vpop.permute.xlu0 %840  ;;  %v891_v29 = vpop.permute.xlu1 %890 }
  0xe4   : > { %v3217_v31 = vpack.c.bf16 %v928_v27, %v924_v26  ;;  %v846_v35 = vsel %vm844_vm11, %v841_v28, %v843_v21  ;;  %v3294_v21 = vsub.f32 %v3180_v11, %v922_v16  ;;  %v3302_v22 = vsub.f32 %v3208_v25, %v924_v26 }
  0xe5   : > { %v850_v41 = vsel %vm3171_vm7, %v846_v35, 0.0  ;;  %v1029_v11 = vsub.f32 %v3252_v59, %v1028_v63  ;;  %v3881_v35 = vand.u32 4294901760, %v3297_v15 }
  0xe6   : > { %2529 = vmatpush1.bf16.msra.mxu1 %v3217_v31  ;;  %v934_v49 = vand.u32 4294901760, %v850_v41 }
  0xe7   : > { %v839_v34 = vpop.permute.xlu0 %838  ;;  %v889_v36 = vpop.permute.xlu1 %888 }
  0xe8   : > { %v845_v37 = vsel %vm844_vm11, %v839_v34, %v841_v28  ;;  %v894_v39 = vsel %vm299_vm2, %v889_v36, %v891_v29  ;;  %v1012_v28 = vand.u32 4294901760, %v3268_v3  ;;  %v1034_v34 = vand.u32 4294901760, %v3294_v21 }
  0xe9   : > { %v3228_v38 = vsel %vm3189_vm9, %v845_v37, 0.0  ;;  %v932_v48 = vand.u32 4294901760, %v894_v39  ;;  %v1023_v36 = vsub.f32 %v3261_v2, %v1022_v19  ;;  %v1001_v37 = vand.u32 4294901760, %v3288_v14 }
  0xea   : > { %v936_v46 = vand.u32 4294901760, %v3228_v38 }
  0xeb   : > { %v893_v44 = vpop.permute.xlu0 %892  ;;  %v856_v45 = vpop.permute.xlu1 %855 }
  0xec   : > { %v895_v47 = vsel %vm299_vm2, %v891_v29, %v893_v44  ;;  %v3254_v61 = vpack.c.bf16 %v936_v46, %v932_v48  ;;  %v1018_v29 = vand.u32 4294901760, %v3273_v9  ;;  %v3882_v44 = vand.u32 4294901760, %v3302_v22 }
  0xed   : > { %v930_v50 = vand.u32 4294901760, %v895_v47 }
  0xef   : > { %v854_v52 = vpop.permute.xlu0 %853  ;;  %v3245_v53 = vpack.c.bf16 %v934_v49, %v930_v50  ;;  %v901_v55 = vpop.permute.xlu1 %900  ;;  %v3311_v32 = vsub.f32 %v895_v47, %v930_v50 }
  0xf0   : > { %v859_v6 = vsel %vm857_vm12, %v854_v52, %v856_v45  ;;  %v3320_v45 = vsub.f32 %v850_v41, %v934_v49  ;;  %v1047_v41 = vsub.f32 %v3280_v10, %v3883_v30  ;;  %v1035_v49 = vsub.f32 %v3294_v21, %v1034_v34 }
  0xf1   : > { %2531 = vmatprep.subr.bf16.mxu1 %v3245_v53  ;;  %v863_v18 = vsel %vm3138_vm3, %v859_v6, 0.0  ;;  %v3884_v3 = vand.u32 4294901760, %v3311_v32 }
  0xf2   : > { %2533 = vmatpush1.bf16.msra.mxu1 %v3254_v61  ;;  %v938_v25 = vand.u32 4294901760, %v863_v18  ;;  %v3887_v14 = vand.u32 4294901760, %v3320_v45  ;;  %v1048_v30 = vand.u32 4294901760, %v1047_v41 }
  0xf3   : > { %v852_v4 = vpop.permute.xlu0 %851  ;;  %v899_v60 = vpop.permute.xlu1 %898 }
  0xf4   : > { %v858_v1 = vsel %vm857_vm12, %v852_v4, %v854_v52  ;;  %v905_v13 = vsel %vm904_vm13, %v899_v60, %v901_v55  ;;  %v3322_v52 = vsub.f32 %v894_v39, %v932_v48  ;;  %v3327_v4 = vsub.f32 %v3228_v38, %v936_v46 }
  0xf5   : > { %v862_v12 = vsel %vm3142_vm5, %v858_v1, 0.0  ;;  %v944_v27 = vand.u32 4294901760, %v905_v13  ;;  %v1053_v38 = vsub.f32 %v3297_v15, %v3881_v35  ;;  %v1024_v48 = vand.u32 4294901760, %v1023_v36 }
  0xf6   : > { %v940_v16 = vand.u32 4294901760, %v862_v12  ;;  %v1041_v1 = vsub.f32 %v3302_v22, %v3882_v44  ;;  %v1071_v41 = vsub.f32 %v3320_v45, %v3887_v14 }
  0xf7   : > { %v903_v24 = vpop.permute.xlu0 %902  ;;  %v869_v33 = vpop.permute.xlu1 %868  ;;  %v3360_v36 = vsub.f32 %v905_v13, %v944_v27  ;;  %v1036_v13 = vand.u32 4294901760, %v1035_v49 }
  0xf8   : > { %v906_v20 = vsel %vm904_vm13, %v901_v55, %v903_v24  ;;  %v1030_v55 = vand.u32 4294901760, %v1029_v11  ;;  %v3329_v6 = vpack.c.bf16 %v944_v27, %v940_v16  ;;  %v3886_v24 = vand.u32 4294901760, %v3322_v52 }
  0xf9   : > { %v942_v26 = vand.u32 4294901760, %v906_v20  ;;  %v3355_v11 = vsub.f32 %v863_v18, %v938_v25  ;;  %v1059_v18 = vsub.f32 %v3311_v32, %v3884_v3  ;;  %v1042_v27 = vand.u32 4294901760, %v1041_v1 }
  0xfb   : > { %v867_v47 = vpop.permute.xlu0 %866  ;;  %v3324_v50 = vpack.c.bf16 %v942_v26, %v938_v25  ;;  %v3333_v9 = vsub.f32 %v906_v20, %v942_v26  ;;  %v3885_v26 = vand.u32 4294901760, %v3327_v4  ;;  %v1060_v49 = vand.u32 4294901760, %v1059_v18 }
  0xfc   : > { %v872_v60 = vsel %vm870_vm14, %v867_v47, %v869_v33  ;;  %v3358_v33 = vsub.f32 %v862_v12, %v940_v16  ;;  %v2538_v12 = vpack.c.bf16 %v1024_v48, %v1012_v28  ;;  %v2540_v16 = vpack.c.bf16 %v1030_v55, %v1018_v29 }
  0xfd   : > { %2535 = vmatprep.subr.bf16.mxu1 %v3324_v50  ;;  %v876_v39 = vsel %vm3171_vm7, %v872_v60, 0.0  ;;  %v1094_v35 = vand.u32 4294901760, %v3333_v9  ;;  %v1077_v3 = vsub.f32 %v3327_v4, %v3885_v26  ;;  %v3888_v29 = vand.u32 4294901760, %v3360_v36 }
  0xfe   : > { %v3344_v46 = vand.u32 4294901760, %v876_v39  ;;  %2537 = vmatpush1.bf16.msra.mxu1 %v3329_v6  ;;  %v1088_v28 = vand.u32 4294901760, %v3358_v33  ;;  %v2542_v48 = vpack.c.bf16 %v1048_v30, %v1036_v13 }
  0xff   : > { %v865_v20 = vpop.permute.xlu0 %864  ;;  %v1078_v14 = vand.u32 4294901760, %v1077_v3 }
 0x100   : > { %v871_v60 = vsel %vm870_vm14, %v865_v20, %v867_v47  ;;  %947 = vmatprep.subr.mxu1 %v3344_v46  ;;  %v1065_v47 = vsub.f32 %v3322_v52, %v3886_v24  ;;  %v1082_v20 = vand.u32 4294901760, %v3355_v11  ;;  %v3386_v55 = vsub.f32 %v876_v39, %v3344_v46 }
 0x101   : > { %v875_v44 = vsel %vm3189_vm9, %v871_v60, 0.0  ;;  %v1054_v60 = vand.u32 4294901760, %v1053_v38  ;;  %v1095_v38 = vsub.f32 %v3333_v9, %v1094_v35  ;;  %v1072_v24 = vand.u32 4294901760, %v1071_v41 }
 0x102   : > { %v3370_v25 = vand.u32 4294901760, %v875_v44  ;;  %v1066_v1 = vand.u32 4294901760, %v1065_v47  ;;  %v1083_v39 = vsub.f32 %v3355_v11, %v1082_v20  ;;  %v1089_v30 = vsub.f32 %v3358_v33, %v1088_v28 }
 0x103   : > { %v2544_v26 = vpack.c.bf16 %v1054_v60, %v1042_v27  ;;  %v1106_v13 = vand.u32 4294901760, %v3386_v55 }
 0x104   : > { %949 = vmatpush1.msra.mxu1 %v3370_v25  ;;  %v3402_v18 = vsub.f32 %v875_v44, %v3370_v25  ;;  %v1084_v27 = vand.u32 4294901760, %v1083_v39  ;;  %v1090_v47 = vand.u32 4294901760, %v1089_v30  ;;  %v2548_v60 = vpack.c.bf16 %v1078_v14, %v1066_v1 }
 0x105   : > { %2539 = vmatprep.subr.bf16.mxu1 %v2538_v12  ;;  %1002 = vmatmul.mubr.f32.vlgmr.msra.gmra.mrb[2].mxu1 %v1001_v37  ;;  %v1101_v37 = vsub.f32 %v3360_v36, %v3888_v29  ;;  %v2546_v12 = vpack.c.bf16 %v1072_v24, %v1060_v49  ;;  %v1107_v29 = vsub.f32 %v3386_v55, %v1106_v13 }
 0x106   : > { %2541 = vmatpush1.bf16.msra.mxu1 %v2540_v16  ;;  %1162 = vmatprep.mubr.f32.mxu1 %v2925_v0  ;;  %v1096_v16 = vand.u32 4294901760, %v1095_v38  ;;  %v1112_v41 = vand.u32 4294901760, %v3402_v18  ;;  %v2554_v38 = vpack.c.bf16 %v3261_v2, %v3238_v43  ;;  %v2556_v14 = vpack.c.bf16 %v3252_v59, %v3235_v42 }
 0x107   : > { %2543 = vmatprep.subr.bf16.mxu1 %v2542_v48  ;;  %v1102_v3 = vand.u32 4294901760, %v1101_v37  ;;  %v2558_v1 = vpack.c.bf16 %v3280_v10, %v3294_v21  ;;  %v2562_v39 = vpack.c.bf16 %v3320_v45, %v3311_v32  ;;  %v2564_v30 = vpack.c.bf16 %v3327_v4, %v3322_v52 }
 0x108   : > { %v2550_v48 = vpack.c.bf16 %v1096_v16, %v1084_v27  ;;  %v1113_v24 = vsub.f32 %v3402_v18, %v1112_v41  ;;  %v2566_v37 = vpack.c.bf16 %v3333_v9, %v3355_v11  ;;  %v2586_v16 = vpack.c.bf16 %v1022_v19, %v1010_v58 }
 0x109   : > { %v2552_v44 = vpack.c.bf16 %v1102_v3, %v1090_v47  ;;  %v2588_v27 = vpack.c.bf16 %v1028_v63, %v1016_v57  ;;  %v3910_v47 = vand.u32 4294901760, %v3280_v10  ;;  %v3911_v43 = vand.u32 4294901760, %v3302_v22 }
 0x10a   : > { %2545 = vmatpush1.bf16.msra.mxu1 %v2544_v26  ;;  %v1108_v26 = vand.u32 4294901760, %v1107_v29  ;;  %v1114_v49 = vand.u32 4294901760, %v1113_v24  ;;  %v2560_v29 = vpack.c.bf16 %v3297_v15, %v3302_v22  ;;  %v3912_v42 = vand.u32 4294901760, %v3297_v15 }
 0x10b   : > { %2547 = vmatprep.subr.bf16.mxu1 %v2546_v12  ;;  %v2568_v12 = vpack.c.bf16 %v3360_v36, %v3358_v33  ;;  %v2590_v3 = vpack.c.bf16 %v3910_v47, %v1034_v34  ;;  %v3913_v57 = vand.u32 4294901760, %v3311_v32  ;;  %v3914_v59 = vand.u32 4294901760, %v3320_v45 }
 0x10c   : > { %v2592_v58 = vpack.c.bf16 %v3912_v42, %v3911_v43  ;;  %v3916_v2 = vand.u32 4294901760, %v3327_v4  ;;  %v2598_v10 = vpack.c.bf16 %v1094_v35, %v1082_v20  ;;  %v3917_v19 = vand.u32 4294901760, %v3360_v36 }
 0x10e   : > { %2549 = vmatpush1.bf16.msra.mxu1 %v2548_v60  ;;  %v2600_v21 = vpack.c.bf16 %v3917_v19, %v1088_v28 }
 0x10f   : > { %2551 = vmatprep.subr.bf16.mxu1 %v2550_v48 }
 0x112   : > { %2553 = vmatpush1.bf16.msra.mxu1 %v2552_v44 }
 0x113   : > { %1109 = vmatprep.subr.mxu1 %v1108_v26 }
 0x116   : > { %1115 = vmatpush1.msra.mxu1 %v1114_v49 }
 0x117   : > { %2555 = vmatprep.subr.bf16.mxu1 %v2554_v38  ;;  %1164 = vmatmul.mubr.f32.vlgmr.msra.gmra.mrb[2].mxu1 %v3231_v40 }
 0x118   : > { %2557 = vmatpush1.bf16.msra.mxu1 %v2556_v14  ;;  %1270 = vmatprep.mubr.f32.mxu1 %v2925_v0 }
 0x119   : > { %2559 = vmatprep.subr.bf16.mxu1 %v2558_v1 }
 0x11c   : > { %2561 = vmatpush1.bf16.msra.mxu1 %v2560_v29 }
 0x11d   : > { %2563 = vmatprep.subr.bf16.mxu1 %v2562_v39 }
 0x120   : > { %2565 = vmatpush1.bf16.msra.mxu1 %v2564_v30  ;;  %v1727_v30 = vld [vmem:[%s3876_s2] sm:$0xff] }
 0x121   : > { %2567 = vmatprep.subr.bf16.mxu1 %v2566_v37 }
 0x124   : > { %2569 = vmatpush1.bf16.msra.mxu1 %v2568_v12 }
 0x125   : > { %1220 = vmatprep.subr.mxu1 %v3386_v55 }
 0x128   : > { %1223 = vmatpush1.msra.mxu1 %v3402_v18 }
 0x129   : > { %2571 = vmatprep.subr.bf16.mxu1 %v3165_v5  ;;  %1273 = vmatmul.mubr.f32.vlgmr.msra.gmra.mrb[2].mxu1 %v3243_v51  ;;  %v2594_v51 = vpack.c.bf16 %v3914_v59, %v3913_v57 }
 0x12a   : > { %2573 = vmatpush1.bf16.msra.mxu1 %v3169_v7  ;;  %1361 = vmatprep.mubr.f32.mxu1 %v2925_v0 }
 0x12b   : > { %2575 = vmatprep.subr.bf16.mxu1 %v3204_v23 }
 0x12e   : > { %2577 = vmatpush1.bf16.msra.mxu1 %v3217_v31 }
 0x12f   : > { %2579 = vmatprep.subr.bf16.mxu1 %v3245_v53 }
 0x132   : > { %2581 = vmatpush1.bf16.msra.mxu1 %v3254_v61 }
 0x133   : > { %2583 = vmatprep.subr.bf16.mxu1 %v3324_v50 }
 0x136   : > { %2585 = vmatpush1.bf16.msra.mxu1 %v3329_v6 }
 0x137   : > { %1312 = vmatprep.subr.mxu1 %v3344_v46 }
 0x13a   : > { %1314 = vmatpush1.msra.mxu1 %v3370_v25 }
 0x13b   : > { %2587 = vmatprep.subr.bf16.mxu1 %v2586_v16  ;;  %1365 = vmatmul.mubr.f32.vlgmr.msra.gmra.mrb[2].mxu1 %v999_v62  ;;  %v3915_v62 = vand.u32 4294901760, %v3322_v52  ;;  %v1729_v16 = vsel %vm910_vm10, %v1727_v30, 0 }
 0x13c   : > { %2589 = vmatpush1.bf16.msra.mxu1 %v2588_v27  ;;  %1489 = vmatprep.mubr.f32.mxu1 %v2925_v0  ;;  %v3534_v42 = vand.u32 4294901760, %v1729_v16 }
 0x13d   : > { %2591 = vmatprep.subr.bf16.mxu1 %v2590_v3  ;;  %v2596_v63 = vpack.c.bf16 %v3916_v2, %v3915_v62 }
 0x140   : > { %2593 = vmatpush1.bf16.msra.mxu1 %v2592_v58 }
 0x141   : > { %2595 = vmatprep.subr.bf16.mxu1 %v2594_v51 }
 0x144   : > { %2597 = vmatpush1.bf16.msra.mxu1 %v2596_v63 }
 0x145   : > { %2599 = vmatprep.subr.bf16.mxu1 %v2598_v10 }
 0x148   : > { %2601 = vmatpush1.bf16.msra.mxu1 %v2600_v21 }
 0x149   : > { %1438 = vmatprep.subr.mxu1 %v1106_v13 }
 0x14c   : > { %1442 = vmatpush1.msra.mxu1 %v1112_v41 }
 0x14d   : > { %2603 = vmatprep.subr.bf16.mxu1 %v3165_v5  ;;  %1491 = vmatmul.mubr.f32.vlgmr.msra.gmra.mrb[2].mxu1 %v3231_v40 }
 0x14e   : > { %2605 = vmatpush1.bf16.msra.mxu1 %v3169_v7  ;;  %1579 = vmatprep.mubr.f32.mxu1 %v2925_v0 }
 0x14f   : > { %2607 = vmatprep.subr.bf16.mxu1 %v3204_v23 }
 0x152   : > { %2609 = vmatpush1.bf16.msra.mxu1 %v3217_v31 }
 0x153   : > { %2611 = vmatprep.subr.bf16.mxu1 %v3245_v53  ;;  %v1591_v53 = vpop.permute.xlu1 %1590 }
 0x156   : > { %2613 = vmatpush1.bf16.msra.mxu1 %v3254_v61 }
 0x157   : > { %2615 = vmatprep.subr.bf16.mxu1 %v3324_v50 }
 0x15a   : > { %2617 = vmatpush1.bf16.msra.mxu1 %v3329_v6 }
 0x15b   : > { %1530 = vmatprep.subr.mxu1 %v3344_v46 }
 0x15e   : > { %1532 = vmatpush1.msra.mxu1 %v3370_v25 }
 0x15f   : > { %1581 = vmatmul.mubr.f32.vlgmr.msra.gmra.mrb[2].mxu1 %v3231_v40 }
 0x198   : > { %v540_v5 = vpop.f32.mrb[0].mxu1 }
 0x199   : > { %v768_v7 = vpop.f32.mrb[0].mxu0  ;;  %v542_v15 = vpop.f32.mrb[1].mxu1 }
 0x19a   : > { %v3496_v23 = vadd.f32 %v768_v7, %v540_v5  ;;  %v770_v31 = vpop.f32.mrb[1].mxu0  ;;  %v3545_v5 = vsub.f32 %v1729_v16, %v3534_v42 }
 0x19b   : > { %v3498_v22 = vadd.f32 %v770_v31, %v542_v15 }
 0x232   : > { %v1582_v61 = vpop.f32.mrb[2].mxu1 }
 0x233   : > { %v1593_v32 = vmul.f32 %v1591_v53, %v1582_v61  ;;  %v1584_v34 = vpop.f32.mrb[3].mxu1 }
 0x234   : > { %v1594_v35 = vmul.f32 %v1591_v53, %v1584_v34 }
 0x235   : > { %v1595_v45 = vsub.f32 0.0, %v1593_v32 }
 0x236   : > { %v1596_v52 = vsub.f32 0.0, %v1594_v35 }
 0x237   : > { %v1597_v50 = vmul.f32 1.442695, %v1595_v45 }
 0x238   : > { %v1599_v4 = vmul.f32 1.442695, %v1596_v52 }
 0x239   : > { %2818 = vpow2.f32 %v1597_v50 }
 0x23a   : > { %2820 = vpow2.f32 %v1599_v4 }
 0x243   : > { %v2819_v40 = vpop.eup %2818 }
 0x244   : > { %v2821_v6 = vpop.eup %2820  ;;  %v1601_v9 = vadd.f32 1.0, %v2819_v40  ;;  %v1816_v40 = vand.u32 4294901760, %v3545_v5 }
 0x245   : > { %v1602_v46 = vadd.f32 1.0, %v2821_v6 }
 0x246   : > { %2822 = vrcp.f32 %v1601_v9 }
 0x247   : > { %2824 = vrcp.f32 %v1602_v46 }
 0x250   : > { %v2823_v11 = vpop.eup %2822 }
 0x251   : > { %v2825_v33 = vpop.eup %2824  ;;  %v1607_v36 = vmul.f32 %v2823_v11, %v1593_v32 }
 0x252   : > { %v1608_v25 = vmul.f32 %v2825_v33, %v1594_v35 }
 0x253   : > { %v1609_v20 = vmul.f32 1.6778524, %v1607_v36 }
 0x254   : > { %v1610_v28 = vmul.f32 1.6778524, %v1608_v25 }
 0x255   : > { %1616 = vrot.lane.b32.xlu0 %v1609_v20, %s2935_s9 }
 0x256   : > { %1618 = vrot.lane.b32.xlu1 %v1610_v28, %s2935_s9 }
 0x2c7   : > { %v1617_v55 = vpop.permute.xlu0 %1616 }
 0x2c8   : > { %1626 = vst.msk [vmem:[#allocation3] sm:$0xff] %vm1625_vm15, %v1617_v55  ;;  %v1619_v18 = vpop.permute.xlu1 %1618 }
 0x2c9   : > { %v1621_v13 = vsel %vm1620_vm0, %v1617_v55, %v1619_v18  ;;  %1628 = vst.msk [vmem:[#allocation3 + $0x10] sm:$0xff] %vm1620_vm0, %v1619_v18 }
 0x2ca   : > { %v1632_v12 = vsel %vm3138_vm3, %v1621_v13, 0.0 }
 0x2cb   : > { %v1731_v43 = vand.u32 4294901760, %v1632_v12 }
 0x2cd   : > { %v3538_v51 = vsub.f32 %v1632_v12, %v1731_v43 }
 0x2cf   : > { %v1629_v41 = vld [vmem:[#allocation3] sm:$0xff]  ;;  %v1827_v45 = vand.u32 4294901760, %v3538_v51 }
 0x2d0   : > { %1697 = vrot.lane.b32.xlu0 %v1629_v41, %s2927_s28  ;;  %1637 = vrot.lane.b32.xlu1 %v1629_v41, %s2928_s12  ;;  %v1633_v60 = vld [vmem:[#allocation3 + $0x10] sm:$0xff]  ;;  %v1631_v37 = vsel %vm3142_vm5, %v1629_v41, 0.0 }
 0x2d1   : > { %v1733_v3 = vand.u32 4294901760, %v1631_v37  ;;  %v3574_v28 = vsub.f32 %v3538_v51, %v1827_v45 }
 0x2d3   : > { %v3536_v58 = vsub.f32 %v1631_v37, %v1733_v3 }
 0x2d4   : > { %1649 = vrot.lane.b32.xlu0 %v1629_v41, %s2929_s14  ;;  %1661 = vrot.lane.b32.xlu1 %v1629_v41, %s2930_s15 }
 0x2d5   : > { %v1833_v52 = vand.u32 4294901760, %v3536_v58 }
 0x2d7   : > { %v3579_v55 = vsub.f32 %v3536_v58, %v1833_v52 }
 0x2d8   : > { %1707 = vrot.lane.b32.xlu0 %v1629_v41, %s2926_s11  ;;  %1701 = vrot.lane.b32.xlu1 %v1633_v60, %s2927_s28 }
 0x2dc   : > { %1641 = vrot.lane.b32.xlu0 %v1633_v60, %s2928_s12  ;;  %1711 = vrot.lane.b32.xlu1 %v1633_v60, %s2926_s11 }
 0x2e0   : > { %1653 = vrot.lane.b32.xlu0 %v1633_v60, %s2929_s14  ;;  %1673 = vrot.lane.b32.xlu1 %v1629_v41, %s2931_s25 }
 0x2e4   : > { %1665 = vrot.lane.b32.xlu0 %v1633_v60, %s2930_s15  ;;  %1721 = vrot.lane.b32.xlu1 %v1633_v60, %s2932_s26 }
 0x2e8   : > { %1639 = vrot.lane.b32.xlu1 %v1621_v13, %s2928_s12  ;;  %1699 = vrot.lane.b32.xlu0 %v1621_v13, %s2927_s28  ;;  %s2514_s12 = sshll.u32 %s3066_s13, 4 }
 0x2ec   : > { %1651 = vrot.lane.b32.xlu1 %v1621_v13, %s2929_s14  ;;  %1677 = vrot.lane.b32.xlu0 %v1633_v60, %s2931_s25  ;;  %s2521_s14 = sshll.u32 %s2988_s22, 8  ;;  %s2413_s22 = scalar_lea.sflag [#allocation6], %s3066_s13 }
 0x2ed   : > { %s3830_s10 = scalar_lea.hbm %s3879_s5, %s2521_s14 }
 0x2f0   : > { %1663 = vrot.lane.b32.xlu1 %v1621_v13, %s2930_s15  ;;  %1709 = vrot.lane.b32.xlu0 %v1621_v13, %s2926_s11  ;;  %s253_s15 = scalar_lea.vmem [#allocation7], %s2514_s12 }
 0x2f4   : > { %1675 = vrot.lane.b32.xlu1 %v1621_v13, %s2931_s25  ;;  %1719 = vrot.lane.b32.xlu0 %v1621_v13, %s2932_s26  ;;  %s2427_s25 = sshll.u32 %s253_s15, 4  ;;  %s3832_s25 = int_to_ptr.vmem [resolvable:$true] %s2427_s25 }
 0x2f5   : > { %s2856_s16 = scalar_lea.vmem %s3832_s25, 256  ;;  %p2863_p10 = scmp.lt.s32.totalorder %s3832_s25, %s2861_s23 }
 0x2f6   : > { %p2857_p11 = scmp.ne.s32.totalorder %s3832_s25, %s2856_s16  ;;  %p2864_p2 = scmp.lt.s32.totalorder %s2862_s6, %s2856_s16 }
 0x2f8   : > { %1687 = vrot.lane.b32.xlu1 %v1621_v13, %s2933_s7  ;;  %1717 = vrot.lane.b32.xlu0 %v1629_v41, %s2932_s26  ;;  %p2858_p13 = pnand %p2857_p11, %p3925_p12  ;;  %p2865_p4 = por %p2864_p2, %p2863_p10 }
 0x2fa   : > { %p2859_p5 = pneg %p2858_p13 }
 0x2fc   : > { %1685 = vrot.lane.b32.xlu1 %v1629_v41, %s2933_s7  ;;  %1689 = vrot.lane.b32.xlu0 %v1633_v60, %s2933_s7  ;;  %v3586_v60 = vsub.f32 %v3545_v5, %v1816_v40  ;;  %p2866_p7 = pnand %p2865_p4, %p2859_p5 }
 0x342   : > { %v1698_v48 = vpop.permute.xlu0 %1697  ;;  %v1638_v44 = vpop.permute.xlu1 %1637 }
 0x346   : > { %v1650_v24 = vpop.permute.xlu0 %1649  ;;  %v1662_v26 = vpop.permute.xlu1 %1661 }
 0x34a   : > { %v1708_v49 = vpop.permute.xlu0 %1707  ;;  %v1702_v38 = vpop.permute.xlu1 %1701 }
 0x34e   : > { %v1642_v14 = vpop.permute.xlu0 %1641  ;;  %v1712_v1 = vpop.permute.xlu1 %1711 }
 0x352   : > { %v1654_v29 = vpop.permute.xlu0 %1653  ;;  %v3524_v39 = vpop.permute.xlu1 %1673 }
 0x356   : > { %v1666_v27 = vpop.permute.xlu0 %1665  ;;  %v1722_v47 = vpop.permute.xlu1 %1721 }
 0x35a   : > { %v1700_v57 = vpop.permute.xlu0 %1699  ;;  %v1640_v59 = vpop.permute.xlu1 %1639 }
 0x35b   : > { %v1703_v62 = vsel %vm883_vm4, %v1698_v48, %v1700_v57  ;;  %v1704_v2 = vsel %vm883_vm4, %v1700_v57, %v1702_v38  ;;  %v1643_v63 = vsel %vm818_vm6, %v1638_v44, %v1640_v59  ;;  %v1644_v10 = vsel %vm818_vm6, %v1640_v59, %v1642_v14 }
 0x35c   : > { %v1735_v19 = vand.u32 4294901760, %v1704_v2  ;;  %v1737_v21 = vand.u32 4294901760, %v1703_v62  ;;  %v1647_v15 = vsel %vm3189_vm9, %v1643_v63, 0.0  ;;  %v1648_v31 = vsel %vm3171_vm7, %v1644_v10, 0.0 }
 0x35d   : > { %v1739_v9 = vand.u32 4294901760, %v1648_v31  ;;  %v1741_v46 = vand.u32 4294901760, %v1647_v15  ;;  %v1818_v63 = vand.u32 4294901760, %v3586_v60  ;;  %v1835_v10 = vand.u32 4294901760, %v3579_v55 }
 0x35e   : > { %v3547_v7 = vpack.c.bf16 %v1737_v21, %v1733_v3  ;;  %v1678_v53 = vpop.permute.xlu0 %1677  ;;  %v1652_v61 = vpop.permute.xlu1 %1651  ;;  %v3553_v32 = vpack.c.bf16 %v1735_v19, %v1731_v43  ;;  %v3559_v50 = vsub.f32 %v1703_v62, %v1737_v21  ;;  %v3565_v6 = vsub.f32 %v1704_v2, %v1735_v19 }
 0x35f   : > { %v1655_v34 = vsel %vm831_vm8, %v1650_v24, %v1652_v61  ;;  %v1656_v35 = vsel %vm831_vm8, %v1652_v61, %v1654_v29  ;;  %v3589_v44 = vsub.f32 %v1648_v31, %v1739_v9  ;;  %v3591_v24 = vsub.f32 %v1647_v15, %v1741_v46 }
 0x360   : > { %v1659_v4 = vsel %vm3142_vm5, %v1655_v34, 0.0  ;;  %2619 = vmatprep.subr.bf16.mxu0 %v3553_v32  ;;  %v1660_v11 = vsel %vm3138_vm3, %v1656_v35, 0.0  ;;  %v1845_v18 = vand.u32 4294901760, %v3559_v50  ;;  %v1839_v48 = vand.u32 4294901760, %v3565_v6 }
 0x361   : > { %2621 = vmatpush1.bf16.msra.mxu0 %v3547_v7  ;;  %v1745_v33 = vand.u32 4294901760, %v1659_v4  ;;  %v1743_v13 = vand.u32 4294901760, %v1660_v11  ;;  %v3890_v62 = vand.u32 4294901760, %v3589_v44  ;;  %v1829_v2 = vand.u32 4294901760, %v3574_v28 }
 0x362   : > { %v1710_v36 = vpop.permute.xlu0 %1709  ;;  %v1664_v25 = vpop.permute.xlu1 %1663 }
 0x363   : > { %v1713_v20 = vsel %vm299_vm2, %v1708_v49, %v1710_v36  ;;  %v1714_v41 = vsel %vm299_vm2, %v1710_v36, %v1712_v1  ;;  %v1667_v49 = vsel %vm844_vm11, %v1662_v26, %v1664_v25  ;;  %v3594_v38 = vsub.f32 %v1659_v4, %v1745_v33 }
 0x364   : > { %v1749_v14 = vand.u32 4294901760, %v1713_v20  ;;  %v1668_v29 = vsel %vm844_vm11, %v1664_v25, %v1666_v27  ;;  %v1671_v1 = vsel %vm3189_vm9, %v1667_v49, 0.0  ;;  %v3599_v12 = vpack.c.bf16 %v1745_v33, %v1741_v46 }
 0x365   : > { %v1747_v16 = vand.u32 4294901760, %v1714_v41  ;;  %v1672_v3 = vsel %vm3171_vm7, %v1668_v29, 0.0  ;;  %v1753_v43 = vand.u32 4294901760, %v1671_v1  ;;  %v3606_v26 = vsub.f32 %v3559_v50, %v1845_v18 }
 0x366   : > { %v1720_v30 = vpop.permute.xlu0 %1719  ;;  %v1676_v37 = vpop.permute.xlu1 %1675  ;;  %v1751_v57 = vand.u32 4294901760, %v1672_v3  ;;  %v3608_v59 = vpack.c.bf16 %v1743_v13, %v1739_v9  ;;  %v3615_v19 = vsub.f32 %v1660_v11, %v1743_v13  ;;  %v3889_v21 = vand.u32 4294901760, %v3594_v38 }
 0x367   : > { %v1724_v27 = vsel %vm904_vm13, %v1720_v30, %v1722_v47  ;;  %v3618_v15 = vpack.c.bf16 %v1753_v43, %v1749_v14  ;;  %v1679_v31 = vsel %vm857_vm12, %v3524_v39, %v1676_v37  ;;  %v1680_v35 = vsel %vm857_vm12, %v1676_v37, %v1678_v53 }
 0x368   : > { %2623 = vmatprep.subr.bf16.mxu0 %v3608_v59  ;;  %v1759_v34 = vand.u32 4294901760, %v1724_v27  ;;  %v1683_v4 = vsel %vm3142_vm5, %v1679_v31, 0.0  ;;  %v3627_v9 = vpack.c.bf16 %v1751_v57, %v1747_v16  ;;  %v1847_v46 = vand.u32 4294901760, %v3606_v26 }
 0x369   : > { %2625 = vmatpush1.bf16.msra.mxu0 %v3599_v12  ;;  %v3892_v11 = vand.u32 4294901760, %v3591_v24  ;;  %v1684_v33 = vsel %vm3138_vm3, %v1680_v35, 0.0  ;;  %v1840_v39 = vsub.f32 %v3565_v6, %v1839_v48  ;;  %v3636_v36 = vsub.f32 %v1714_v41, %v1747_v16 }
 0x36a   : > { %v1718_v47 = vpop.permute.xlu0 %1717  ;;  %v1688_v61 = vpop.permute.xlu1 %1687  ;;  %v3638_v25 = vsub.f32 %v1713_v20, %v1749_v14  ;;  %v1755_v53 = vand.u32 4294901760, %v1684_v33  ;;  %2627 = vmatprep.subr.bf16.mxu0 %v3627_v9  ;;  %v3642_v13 = vsub.f32 %v1672_v3, %v1751_v57  ;;  %v3644_v49 = vsub.f32 %v1671_v1, %v1753_v43 }
 0x36b   : > { %v1723_v56 = vsel %vm904_vm13, %v1718_v47, %v1720_v30  ;;  %v1757_v29 = vand.u32 4294901760, %v1683_v4  ;;  %v3891_v31 = vand.u32 4294901760, %v3615_v19  ;;  %v1870_v20 = vsub.f32 %v3594_v38, %v3889_v21 }
 0x36c   : > { %v1761_v54 = vand.u32 4294901760, %v1723_v56  ;;  %v3650_v41 = vsub.f32 %v1724_v27, %v1759_v34  ;;  %v3653_v14 = vpack.c.bf16 %v1759_v34, %v1755_v53  ;;  %v3655_v30 = vsub.f32 %v1684_v33, %v1755_v53 }
 0x36d   : > { %2629 = vmatpush1.bf16.msra.mxu0 %v3618_v15  ;;  %v1875_v43 = vand.u32 4294901760, %v3636_v36  ;;  %v3893_v57 = vand.u32 4294901760, %v3638_v25  ;;  %v3895_v34 = vand.u32 4294901760, %v3642_v13  ;;  %v3894_v35 = vand.u32 4294901760, %v3644_v49 }
 0x36e   : > { %v1690_v37 = vpop.permute.xlu0 %1689  ;;  %v1686_v26 = vpop.permute.xlu1 %1685  ;;  %v3657_v1 = vpack.c.bf16 %v1761_v54, %v1757_v29  ;;  %2631 = vmatprep.subr.bf16.mxu0 %v3653_v14  ;;  %v1841_v53 = vand.u32 4294901760, %v1840_v39  ;;  %v1852_v8 = vsub.f32 %v3589_v44, %v3890_v62  ;;  %v1864_v17 = vsub.f32 %v3615_v19, %v3891_v31 }
 0x36f   : > { %v1692_v16 = vsel %vm870_vm14, %v1688_v61, %v1690_v37  ;;  %v1691_v3 = vsel %vm870_vm14, %v1686_v26, %v1688_v61  ;;  %v3672_v61 = vsub.f32 %v1723_v56, %v1761_v54  ;;  %v1858_v26 = vsub.f32 %v3591_v24, %v3892_v11 }
 0x370   : > { %v1696_v27 = vsel %vm3171_vm7, %v1692_v16, 0.0  ;;  %v1695_v47 = vsel %vm3189_vm9, %v1691_v3, 0.0  ;;  %v1871_v16 = vand.u32 4294901760, %v1870_v20  ;;  %v1911_v39 = vand.u32 4294901760, %v3650_v41 }
 0x371   : > { %v3670_v33 = vand.u32 4294901760, %v1696_v27  ;;  %v3674_v37 = vand.u32 4294901760, %v1695_v47  ;;  %2633 = vmatpush1.bf16.msra.mxu0 %v3657_v1  ;;  %v1899_v56 = vand.u32 4294901760, %v3655_v30  ;;  %v3689_v54 = vsub.f32 %v1683_v4, %v1757_v29 }
 0x372   : > { %v1853_v3 = vand.u32 4294901760, %v1852_v8  ;;  %v1865_v21 = vand.u32 4294901760, %v1864_v17  ;;  %v1876_v62 = vsub.f32 %v3636_v36, %v1875_v43  ;;  %v1882_v31 = vsub.f32 %v3638_v25, %v3893_v57 }
 0x373   : > { %1764 = vmatprep.subr.mxu0 %v3670_v33  ;;  %v1894_v20 = vsub.f32 %v3644_v49, %v3894_v35  ;;  %v2634_v11 = vpack.c.bf16 %v1841_v53, %v1829_v2  ;;  %v1888_v4 = vsub.f32 %v3642_v13, %v3895_v34  ;;  %v1917_v29 = vand.u32 4294901760, %v3672_v61 }
 0x374   : > { %v3707_v8 = vsub.f32 %v1696_v27, %v3670_v33  ;;  %v2636_v17 = vpack.c.bf16 %v1847_v46, %v1835_v10  ;;  %v2638_v57 = vpack.c.bf16 %v1865_v21, %v1853_v3  ;;  %v1877_v28 = vand.u32 4294901760, %v1876_v62 }
 0x375   : > { %1766 = vmatpush1.msra.mxu0 %v3674_v37  ;;  %v1889_v2 = vand.u32 4294901760, %v1888_v4  ;;  %v1900_v53 = vsub.f32 %v3655_v30, %v1899_v56  ;;  %v1912_v27 = vsub.f32 %v3650_v41, %v1911_v39  ;;  %v1859_v35 = vand.u32 4294901760, %v1858_v26 }
 0x376   : > { %2635 = vmatprep.subr.bf16.mxu0 %v2634_v11  ;;  %1819 = vmatmul.mubr.f32.vlgmr.msra.gmra.mrb[2].mxu0 %v1818_v63  ;;  %v1905_v34 = vand.u32 4294901760, %v3689_v54  ;;  %v1883_v55 = vand.u32 4294901760, %v1882_v31  ;;  %v1895_v60 = vand.u32 4294901760, %v1894_v20  ;;  %v1918_v62 = vsub.f32 %v3672_v61, %v1917_v29 }
 0x377   : > { %2637 = vmatpush1.bf16.msra.mxu0 %v2636_v17  ;;  %1979 = vmatprep.mubr.f32.mxu0 %v2925_v0  ;;  %v3726_v63 = vsub.f32 %v1695_v47, %v3674_v37  ;;  %v2640_v10 = vpack.c.bf16 %v1871_v16, %v1859_v35  ;;  %v2642_v21 = vpack.c.bf16 %v1889_v2, %v1877_v28  ;;  %v1901_v46 = vand.u32 4294901760, %v1900_v53 }
 0x378   : > { %2639 = vmatprep.subr.bf16.mxu0 %v2638_v57  ;;  %v1913_v11 = vand.u32 4294901760, %v1912_v27  ;;  %v1923_v26 = vand.u32 4294901760, %v3707_v8  ;;  %v1906_v3 = vsub.f32 %v3689_v54, %v1905_v34  ;;  %v1919_v31 = vand.u32 4294901760, %v1918_v62 }
 0x379   : > { %v1929_v57 = vand.u32 4294901760, %v3726_v63  ;;  %v2644_v20 = vpack.c.bf16 %v1895_v60, %v1883_v55  ;;  %v2650_v53 = vpack.c.bf16 %v3565_v6, %v3538_v51  ;;  %v2652_v27 = vpack.c.bf16 %v3559_v50, %v3536_v58 }
 0x37a   : > { %v2646_v4 = vpack.c.bf16 %v1913_v11, %v1901_v46  ;;  %v1924_v47 = vsub.f32 %v3707_v8, %v1923_v26  ;;  %v1907_v35 = vand.u32 4294901760, %v1906_v3  ;;  %v2654_v55 = vpack.c.bf16 %v3615_v19, %v3589_v44 }
 0x37b   : > { %2641 = vmatpush1.bf16.msra.mxu0 %v2640_v10  ;;  %v1930_v17 = vsub.f32 %v3726_v63, %v1929_v57  ;;  %v2656_v60 = vpack.c.bf16 %v3594_v38, %v3591_v24  ;;  %v2658_v62 = vpack.c.bf16 %v3642_v13, %v3636_v36  ;;  %v2660_v10 = vpack.c.bf16 %v3644_v49, %v3638_v25 }
 0x37c   : > { %2643 = vmatprep.subr.bf16.mxu0 %v2642_v21  ;;  %v2648_v16 = vpack.c.bf16 %v1919_v31, %v1907_v35  ;;  %v1925_v28 = vand.u32 4294901760, %v1924_v47  ;;  %v2662_v21 = vpack.c.bf16 %v3650_v41, %v3655_v30  ;;  %v2664_v46 = vpack.c.bf16 %v3672_v61, %v3689_v54 }
 0x37d   : > { %v1931_v2 = vand.u32 4294901760, %v1930_v17  ;;  %v2682_v11 = vpack.c.bf16 %v1839_v48, %v1827_v45  ;;  %v2684_v3 = vpack.c.bf16 %v1845_v18, %v1833_v52  ;;  %v3918_v31 = vand.u32 4294901760, %v3589_v44 }
 0x37e   : > { %v3920_v51 = vand.u32 4294901760, %v3591_v24  ;;  %v3921_v58 = vand.u32 4294901760, %v3594_v38  ;;  %v3922_v52 = vand.u32 4294901760, %v3642_v13  ;;  %v3923_v50 = vand.u32 4294901760, %v3638_v25 }
 0x37f   : > { %2645 = vmatpush1.bf16.msra.mxu0 %v2644_v20  ;;  %v3919_v20 = vand.u32 4294901760, %v3615_v19  ;;  %v2694_v18 = vpack.c.bf16 %v1911_v39, %v1899_v56  ;;  %v2696_v48 = vpack.c.bf16 %v1917_v29, %v1905_v34  ;;  %v2407_v24 = vmul.f32 0.3939193, %v3498_v22 }
 0x380   : > { %2647 = vmatprep.subr.bf16.mxu0 %v2646_v4  ;;  %v2688_v45 = vpack.c.bf16 %v3921_v58, %v3920_v51 }
 0x381   : > { %v2686_v4 = vpack.c.bf16 %v3919_v20, %v3918_v31 }
 0x383   : > { %2649 = vmatpush1.bf16.msra.mxu0 %v2648_v16 }
 0x384   : > { %1926 = vmatprep.subr.mxu0 %v1925_v28 }
 0x387   : > { %1932 = vmatpush1.msra.mxu0 %v1931_v2 }
 0x388   : > { %2651 = vmatprep.subr.bf16.mxu0 %v2650_v53  ;;  %1981 = vmatmul.mubr.f32.vlgmr.msra.gmra.mrb[2].mxu0 %v3534_v42 }
 0x389   : > { %2653 = vmatpush1.bf16.msra.mxu0 %v2652_v27  ;;  %2087 = vmatprep.mubr.f32.mxu0 %v2925_v0 }
 0x38a   : > { %2655 = vmatprep.subr.bf16.mxu0 %v2654_v55 }
 0x38d   : > { %2657 = vmatpush1.bf16.msra.mxu0 %v2656_v60 }
 0x38e   : > { %2659 = vmatprep.subr.bf16.mxu0 %v2658_v62 }
 0x391   : > { %2661 = vmatpush1.bf16.msra.mxu0 %v2660_v10 }
 0x392   : > { %2663 = vmatprep.subr.bf16.mxu0 %v2662_v21 }
 0x395   : > { %2665 = vmatpush1.bf16.msra.mxu0 %v2664_v46 }
 0x396   : > { %2037 = vmatprep.subr.mxu0 %v3707_v8 }
 0x399   : > { %2040 = vmatpush1.msra.mxu0 %v3726_v63 }
 0x39a   : > { %2667 = vmatprep.subr.bf16.mxu0 %v3553_v32  ;;  %2090 = vmatmul.mubr.f32.vlgmr.msra.gmra.mrb[2].mxu0 %v3545_v5  ;;  %v2690_v5 = vpack.c.bf16 %v3922_v52, %v1875_v43 }
 0x39b   : > { %2669 = vmatpush1.bf16.msra.mxu0 %v3547_v7  ;;  %2178 = vmatprep.mubr.f32.mxu0 %v2925_v0 }
 0x39c   : > { %2671 = vmatprep.subr.bf16.mxu0 %v3608_v59 }
 0x39f   : > { %2673 = vmatpush1.bf16.msra.mxu0 %v3599_v12 }
 0x3a0   : > { %2675 = vmatprep.subr.bf16.mxu0 %v3627_v9 }
 0x3a3   : > { %2677 = vmatpush1.bf16.msra.mxu0 %v3618_v15 }
 0x3a4   : > { %2679 = vmatprep.subr.bf16.mxu0 %v3653_v14 }
 0x3a7   : > { %2681 = vmatpush1.bf16.msra.mxu0 %v3657_v1 }
 0x3a8   : > { %2129 = vmatprep.subr.mxu0 %v3670_v33 }
 0x3ab   : > { %2131 = vmatpush1.msra.mxu0 %v3674_v37 }
 0x3ac   : > { %2683 = vmatprep.subr.bf16.mxu0 %v2682_v11  ;;  %2182 = vmatmul.mubr.f32.vlgmr.msra.gmra.mrb[2].mxu0 %v1816_v40  ;;  %v3924_v40 = vand.u32 4294901760, %v3644_v49 }
 0x3ad   : > { %2685 = vmatpush1.bf16.msra.mxu0 %v2684_v3  ;;  %2306 = vmatprep.mubr.f32.mxu0 %v2925_v0 }
 0x3ae   : > { %2687 = vmatprep.subr.bf16.mxu0 %v2686_v4  ;;  %v2692_v6 = vpack.c.bf16 %v3924_v40, %v3923_v50 }
 0x3b1   : > { %2689 = vmatpush1.bf16.msra.mxu0 %v2688_v45 }
 0x3b2   : > { %2691 = vmatprep.subr.bf16.mxu0 %v2690_v5 }
 0x3b5   : > { %2693 = vmatpush1.bf16.msra.mxu0 %v2692_v6 }
 0x3b6   : > { %2695 = vmatprep.subr.bf16.mxu0 %v2694_v18 }
 0x3b9   : > { %2697 = vmatpush1.bf16.msra.mxu0 %v2696_v48 }
 0x3ba   : > { %2255 = vmatprep.subr.mxu0 %v1923_v26 }
 0x3bd   : > { %2259 = vmatpush1.msra.mxu0 %v1929_v57 }
 0x3be   : > { %2699 = vmatprep.subr.bf16.mxu0 %v3553_v32  ;;  %2308 = vmatmul.mubr.f32.vlgmr.msra.gmra.mrb[2].mxu0 %v3534_v42 }
 0x3bf   : > { %2701 = vmatpush1.bf16.msra.mxu0 %v3547_v7  ;;  %2396 = vmatprep.mubr.f32.mxu0 %v2925_v0  ;;  %v2406_v0 = vmul.f32 0.3939193, %v3496_v23 }
 0x3c0   : > { %2703 = vmatprep.subr.bf16.mxu0 %v3608_v59 }
 0x3c3   : > { %2705 = vmatpush1.bf16.msra.mxu0 %v3599_v12 }
 0x3c4   : > { %2707 = vmatprep.subr.bf16.mxu0 %v3627_v9 }
 0x3c7   : > { %2709 = vmatpush1.bf16.msra.mxu0 %v3618_v15 }
 0x3c8   : > { %2711 = vmatprep.subr.bf16.mxu0 %v3653_v14 }
 0x3cb   : > { %2713 = vmatpush1.bf16.msra.mxu0 %v3657_v1 }
 0x3cc   : > { %2347 = vmatprep.subr.mxu0 %v3670_v33 }
 0x3cf   : > { %2349 = vmatpush1.msra.mxu0 %v3674_v37 }
 0x3d0   : > { %2398 = vmatmul.mubr.f32.vlgmr.msra.gmra.mrb[2].mxu0 %v3534_v42 }
 0x4a3   : > { %v2399_v7 = vpop.f32.mrb[2].mxu0 }
 0x4a4   : > { %v2404_v32 = vmul.f32 0.91914505, %v2399_v7  ;;  %v2401_v44 = vpop.f32.mrb[3].mxu0 }
 0x4a5   : > { %v2405_v38 = vmul.f32 0.91914505, %v2401_v44 }
 0x4a6   : > { %v2408_v12 = vadd.f32 %v2406_v0, %v2404_v32 }
 0x4a7   : > { %v2409_v59 = vadd.f32 %v2407_v24, %v2405_v38 }
 0x4a8   : > { %2410 = vst [vmem:[%s253_s15] sm:$0xff] %v2408_v12 }
 0x4a9   : > { %2411 = vst [vmem:[%s253_s15 + $0x8] sm:$0xff] %v2409_v59 }
 0x4aa   : > { %2869 = shalt.err (!%p2866_p7)
}
 0x4ab   : > { %s2870_s13 = scalar_lea.hbm %s3830_s10, 256  ;;  %s2874_s11 = scalar_lea.hbm %s3879_s5, 512 }
 0x4ac   : > { %p2871_p8 = scmp.ne.s32.totalorder %s3830_s10, %s2870_s13  ;;  %p2875_p1 = scmp.lt.u32.totalorder %s3830_s10, %s3879_s5 }
 0x4ad   : > { %p2876_p3 = scmp.lt.u32.totalorder %s2874_s11, %s2870_s13  ;;  %p2878_p11 = scmp.lt.u32.totalorder %s2870_s13, %s3830_s10 }
 0x4ae   : > { %p2872_p9 = pnand %p2871_p8, %p3925_p12 }
 0x4af   : > { %p2877_p6 = por %p2876_p3, %p2875_p1 }
 0x4b0   : > { %p2873_p0 = pneg %p2872_p9 }
 0x4b1   : > { %p2879_p13 = por %p2878_p11, %p2877_p6 }
 0x4b3   : > { %p2880_p5 = pnand %p2879_p13, %p2873_p0 }
 0x4b5   : > { %2883 = shalt.err (!%p2880_p5)
}
 0x4b6   : > { %2749 = dma.vmem_to_hbm [thread:$0]  (%p3925_p12), %s3832_s25, 256, %s3830_s10, %s2413_s22  }
 0x4b7 PF: > { %s2439_s14 = sand.u32 1, %s2910_s18   ;;  %p3926_p10 = scmp.ne.s32.totalorder %s3898_s30, 0 }
 0x4b8   : > { %p3927_p2 = scmp.ge.s32.totalorder %s2922_s21, 2  ;;  %s2440_s15 = scalar_lea.sflag [#allocation6], %s2439_s14 }
 0x4ba   : > { %p2756_p4 = pnand %p3927_p2, %p3926_p10 }
 0x4bc   : > { %2905 = dma.done.wait (!%p2756_p4), %s2440_s15, 256  }
 0x4bd   : > { %2907 = vsyncadd (!%p2756_p4), %s2440_s15, 4294967040  ;;  %p18_p7 = scmp.ge.s32.totalorder %s2992_s24, 4   ;;  %s3928_s18 = smov %s2914_s19 }
 0x4be   : > { %s3929_s19 = smov %s2918_s20  ;;  %s3930_s20 = smov %s3004_s27 }
 0x4bf   : > { %s3931_s21 = smov %s2992_s24  ;;  %20 = sbr.rel (!%p18_p7) target bundleno = 5 (0x5), region = 88 }
 0x4c6   :  { %2445 = vsyncpa [#allocation5], 1 }
 0x4c7   :  { %2447 = vsyncpa [#allocation5 + $0x1], 1 }
 0x4c8   :  { %2448 = vsyncpa [#allocation6], 1 }
 0x4c9   :  { %2450 = vsyncpa [#allocation6 + $0x1], 1 }

</bundles_post_ra>
